<compile_context>
chip_gen: v5e
topology: v5e:2x2
jax: 0.10.0
libtpu: 0.0.40
codegen_flags: <defaults>
</compile_context>

<pallas_src>
import functools

import jax
import jax.numpy as jnp
import numpy as np
from jax.experimental import pallas as pl
from jax.experimental.pallas import tpu as pltpu

STATE_DIM = 24
ACTION_DIM = 4
TIMES = 2

IN_DIM = STATE_DIM * TIMES        # 48
H1_DIM = STATE_DIM * 32           # 768  (already a multiple of 128)
H2_DIM = ACTION_DIM * 48          # 192  (padded to 256 for lane density)
OUT_DIM = ACTION_DIM              # 4    (padded to 128 for a lane-dense store)

H2_PAD = 256
OUT_PAD = 128

LN_EPS = 1e-5
DEFAULT_TILE_B = 256              # rows per grid step (amortizes per-step overhead)


def _round_up(n, m):
    return ((n + m - 1) // m) * m


def _layernorm(h, gamma, beta, n_features):
    # E[x^2] - mu^2 form: both reductions are independent -> issue in parallel on
    # the XLUs instead of serializing reduce -> sub -> square -> reduce.
    # Padded (zero) columns contribute 0 to both sums, so dividing by the real
    # feature count keeps the statistics exact.
    inv_n = 1.0 / float(n_features)
    s = jnp.sum(h, axis=-1, keepdims=True)
    ss = jnp.sum(h * h, axis=-1, keepdims=True)
    mu = s * inv_n
    var = ss * inv_n - mu * mu
    return (h - mu) * jax.lax.rsqrt(var + LN_EPS) * gamma + beta


def actor_kernel(x_ref,
                 w1_ref, b1_ref, g1_ref, be1_ref,
                 w2_ref, b2_ref, g2_ref, be2_ref,
                 w3_ref, b3_ref,
                 o_ref):
    # lin1 -> layernorm1 -> relu
    x = x_ref[...].astype(jnp.bfloat16)
    h = jnp.dot(x, w1_ref[...], preferred_element_type=jnp.float32) + b1_ref[...]
    h = _layernorm(h, g1_ref[...], be1_ref[...], H1_DIM)
    h = jnp.maximum(h, 0.0)

    # lin2 -> layernorm2 -> relu   (columns H2_DIM..H2_PAD are exactly zero)
    h = jnp.dot(h.astype(jnp.bfloat16), w2_ref[...],
                preferred_element_type=jnp.float32) + b2_ref[...]
    h = _layernorm(h, g2_ref[...], be2_ref[...], H2_DIM)
    h = jnp.maximum(h, 0.0)

    # lin3 -> tanh  (lane-dense padded output; real actions live in lanes 0..3)
    y = jnp.dot(h.astype(jnp.bfloat16), w3_ref[...],
                preferred_element_type=jnp.float32) + b3_ref[...]
    o_ref[...] = jnp.tanh(y).astype(o_ref.dtype)


@functools.partial(jax.jit, static_argnames=("tile_b",))
def actor_forward(x, kp, tile_b=DEFAULT_TILE_B):
    """x: [B, IN_DIM] float32; kp: packed kernel params (see pack_params)."""
    B = x.shape[0]
    tb = min(tile_b, _round_up(B, 8))           # tile is always a multiple of 8
    b_pad = _round_up(B, tb)
    if b_pad != B:
        x = jnp.pad(x, ((0, b_pad - B), (0, 0)))

    grid = (b_pad // tb,)

    def fixed(shape):
        # Weights / biases: block index never changes -> fetched once, stay resident.
        return pl.BlockSpec(shape, lambda i, _s=shape: (0,) * len(_s))

    in_specs = [
        pl.BlockSpec((tb, IN_DIM), lambda i: (i, 0)),
        fixed((IN_DIM, H1_DIM)), fixed((1, H1_DIM)), fixed((1, H1_DIM)), fixed((1, H1_DIM)),
        fixed((H1_DIM, H2_PAD)), fixed((1, H2_PAD)), fixed((1, H2_PAD)), fixed((1, H2_PAD)),
        fixed((H2_PAD, OUT_PAD)), fixed((1, OUT_PAD)),
    ]
    out_specs = pl.BlockSpec((tb, OUT_PAD), lambda i: (i, 0))

    out_padded = pl.pallas_call(
        actor_kernel,
        grid=grid,
        in_specs=in_specs,
        out_specs=out_specs,
        out_shape=jax.ShapeDtypeStruct((b_pad, OUT_PAD), jnp.float32),
        compiler_params=pltpu.CompilerParams(
            dimension_semantics=("parallel",)),
    )(x,
      kp["w1"], kp["b1"], kp["g1"], kp["be1"],
      kp["w2"], kp["b2"], kp["g2"], kp["be2"],
      kp["w3"], kp["b3"])

    return out_padded[:B, :OUT_DIM]


def init_params(key):
    """Logical (unpadded, f32) parameters matching the PyTorch module shapes.

    Linear weights are stored pre-transposed as [in, out]."""
    ks = jax.random.split(key, 6)

    def lin(kw, kb, fan_in, fan_out):
        bound = 1.0 / np.sqrt(fan_in)
        w = jax.random.uniform(kw, (fan_in, fan_out), jnp.float32, -bound, bound)
        b = jax.random.uniform(kb, (fan_out,), jnp.float32, -bound, bound)
        return w, b

    w1, b1 = lin(ks[0], ks[1], IN_DIM, H1_DIM)
    w2, b2 = lin(ks[2], ks[3], H1_DIM, H2_DIM)
    w3, b3 = lin(ks[4], ks[5], H2_DIM, OUT_DIM)

    # nn.LayerNorm default init.
    g1 = jnp.ones((H1_DIM,), jnp.float32)
    be1 = jnp.zeros((H1_DIM,), jnp.float32)
    g2 = jnp.ones((H2_DIM,), jnp.float32)
    be2 = jnp.zeros((H2_DIM,), jnp.float32)

    return dict(w1=w1, b1=b1, g1=g1, be1=be1,
                w2=w2, b2=b2, g2=g2, be2=be2,
                w3=w3, b3=b3)


def pack_params(p):
    """Kernel-ready params: bf16 weights, f32 bias/LN rows, lane-dense padding."""
    def pad_cols(a, n):
        return jnp.pad(a, ((0, 0), (0, n - a.shape[1])))

    def pad_row(v, n):
        return jnp.pad(v, (0, n - v.shape[0])).reshape(1, n)

    w3_padded = pad_cols(jnp.pad(p["w3"], ((0, H2_PAD - H2_DIM), (0, 0))), OUT_PAD)

    return dict(
        w1=p["w1"].astype(jnp.bfloat16),
        b1=p["b1"].reshape(1, H1_DIM),
        g1=p["g1"].reshape(1, H1_DIM),
        be1=p["be1"].reshape(1, H1_DIM),
        w2=pad_cols(p["w2"], H2_PAD).astype(jnp.bfloat16),
        b2=pad_row(p["b2"], H2_PAD),
        g2=pad_row(p["g2"], H2_PAD),
        be2=pad_row(p["be2"], H2_PAD),
        w3=w3_padded.astype(jnp.bfloat16),
        b3=pad_row(p["b3"], OUT_PAD),
    )


def actor_reference(x, p):
    """Pure-JAX reference (unpadded), with the same bf16 matmul quantization."""
    def dot_bf16(a, w):
        return jnp.dot(a.astype(jnp.bfloat16), w.astype(jnp.bfloat16),
                       preferred_element_type=jnp.float32)

    def ln(h, g, b):
        mu = jnp.mean(h, axis=-1, keepdims=True)
        var = jnp.mean(jnp.square(h - mu), axis=-1, keepdims=True)
        return (h - mu) * jax.lax.rsqrt(var + LN_EPS) * g + b

    h = dot_bf16(x, p["w1"]) + p["b1"]
    h = jnp.maximum(ln(h, p["g1"], p["be1"]), 0.0)
    h = dot_bf16(h, p["w2"]) + p["b2"]
    h = jnp.maximum(ln(h, p["g2"], p["be2"]), 0.0)
    return jnp.tanh(dot_bf16(h, p["w3"]) + p["b3"])


if __name__ == "__main__":
    key = jax.random.PRNGKey(0)
    k_params, k_x = jax.random.split(key)

    params = init_params(k_params)
    kparams = pack_params(params)

    batch = 24
    x = jax.random.normal(k_x, (batch, IN_DIM), jnp.float32)

    ref = jax.block_until_ready(actor_reference(x, params))

    # Multi-step grid path (tile_b=8 -> grid of 3 steps).
    out = jax.block_until_ready(actor_forward(x, kparams, tile_b=8))
    assert out.shape == (batch, OUT_DIM)
    np.testing.assert_allclose(np.asarray(out), np.asarray(ref), rtol=1e-4, atol=1e-4)

    # Default (single-step) path, including a batch that needs sublane padding.
    out2 = jax.block_until_ready(actor_forward(x, kparams))
    np.testing.assert_allclose(np.asarray(out2), np.asarray(ref), rtol=1e-4, atol=1e-4)

    x_odd = x[:13]
    out3 = jax.block_until_ready(actor_forward(x_odd, kparams))
    np.testing.assert_allclose(np.asarray(out3), np.asarray(ref)[:13], rtol=1e-4, atol=1e-4)

    print("KERNEL_OK")
</pallas_src>

<mosaic_0001>
module attributes {stable_mosaic.version = 11 : i64} {
  func.func @actor_kernel(%arg0: i32, %arg1: memref<8x48xf32, #tpu.memory_space<vmem>>, %arg2: memref<48x768xbf16, #tpu.memory_space<vmem>>, %arg3: memref<1x768xf32, #tpu.memory_space<vmem>>, %arg4: memref<1x768xf32, #tpu.memory_space<vmem>>, %arg5: memref<1x768xf32, #tpu.memory_space<vmem>>, %arg6: memref<768x256xbf16, #tpu.memory_space<vmem>>, %arg7: memref<1x256xf32, #tpu.memory_space<vmem>>, %arg8: memref<1x256xf32, #tpu.memory_space<vmem>>, %arg9: memref<1x256xf32, #tpu.memory_space<vmem>>, %arg10: memref<256x128xbf16, #tpu.memory_space<vmem>>, %arg11: memref<1x128xf32, #tpu.memory_space<vmem>>, %arg12: memref<8x128xf32, #tpu.memory_space<vmem>>) attributes {dimension_semantics = [#tpu.dimension_semantics<parallel>], iteration_bounds = array<i64: 3>, scalar_prefetch = 0 : i64, scratch_operands = 0 : i64, tpu.core_type = #tpu.core_type<tc>, window_params = [{transform_indices = @transform_0, window_bounds = array<i64: 8, 48>}, {pipeline_mode = #tpu.pipeline_mode<synchronous>, transform_indices = @transform_1, window_bounds = array<i64: 48, 768>}, {pipeline_mode = #tpu.pipeline_mode<synchronous>, transform_indices = @transform_2, window_bounds = array<i64: 1, 768>}, {pipeline_mode = #tpu.pipeline_mode<synchronous>, transform_indices = @transform_3, window_bounds = array<i64: 1, 768>}, {pipeline_mode = #tpu.pipeline_mode<synchronous>, transform_indices = @transform_4, window_bounds = array<i64: 1, 768>}, {pipeline_mode = #tpu.pipeline_mode<synchronous>, transform_indices = @transform_5, window_bounds = array<i64: 768, 256>}, {pipeline_mode = #tpu.pipeline_mode<synchronous>, transform_indices = @transform_6, window_bounds = array<i64: 1, 256>}, {pipeline_mode = #tpu.pipeline_mode<synchronous>, transform_indices = @transform_7, window_bounds = array<i64: 1, 256>}, {pipeline_mode = #tpu.pipeline_mode<synchronous>, transform_indices = @transform_8, window_bounds = array<i64: 1, 256>}, {pipeline_mode = #tpu.pipeline_mode<synchronous>, transform_indices = @transform_9, window_bounds = array<i64: 256, 128>}, {pipeline_mode = #tpu.pipeline_mode<synchronous>, transform_indices = @transform_10, window_bounds = array<i64: 1, 128>}, {transform_indices = @transform_11, window_bounds = array<i64: 8, 128>}]} {
    %c0 = arith.constant 0 : index
    %c0_0 = arith.constant 0 : index
    %0 = vector.load %arg1[%c0, %c0_0] : memref<8x48xf32, #tpu.memory_space<vmem>>, vector<8x48xf32>
    %1 = arith.truncf %0 : vector<8x48xf32> to vector<8x48xbf16>
    %c0_1 = arith.constant 0 : index
    %c0_2 = arith.constant 0 : index
    %2 = vector.load %arg2[%c0_1, %c0_2] : memref<48x768xbf16, #tpu.memory_space<vmem>>, vector<48x768xbf16>
    %cst = arith.constant dense<0.000000e+00> : vector<8x768xf32>
    %3 = tpu.matmul %1, %2, %cst {dimension_numbers = #tpu.dot_dimension_numbers<[1], [0], [0], [1], [0, 0, 1, 1], [], []>} : vector<8x48xbf16>, vector<48x768xbf16>, vector<8x768xf32> -> vector<8x768xf32>
    %c0_3 = arith.constant 0 : index
    %c0_4 = arith.constant 0 : index
    %4 = vector.load %arg3[%c0_3, %c0_4] : memref<1x768xf32, #tpu.memory_space<vmem>>, vector<1x768xf32>
    %5 = vector.broadcast %4 : vector<1x768xf32> to vector<8x768xf32>
    %6 = arith.addf %3, %5 : vector<8x768xf32>
    %c0_5 = arith.constant 0 : index
    %c0_6 = arith.constant 0 : index
    %7 = vector.load %arg4[%c0_5, %c0_6] : memref<1x768xf32, #tpu.memory_space<vmem>>, vector<1x768xf32>
    %c0_7 = arith.constant 0 : index
    %c0_8 = arith.constant 0 : index
    %8 = vector.load %arg5[%c0_7, %c0_8] : memref<1x768xf32, #tpu.memory_space<vmem>>, vector<1x768xf32>
    %cst_9 = arith.constant dense<0.000000e+00> : vector<8xf32>
    %9 = vector.multi_reduction <add>, %6, %cst_9 [1] : vector<8x768xf32> to vector<8xf32>
    %10 = vector.shape_cast %9 : vector<8xf32> to vector<8x1xf32>
    %11 = arith.mulf %6, %6 : vector<8x768xf32>
    %cst_10 = arith.constant dense<0.000000e+00> : vector<8xf32>
    %12 = vector.multi_reduction <add>, %11, %cst_10 [1] : vector<8x768xf32> to vector<8xf32>
    %13 = vector.shape_cast %12 : vector<8xf32> to vector<8x1xf32>
    %cst_11 = arith.constant 0.00130208337 : f32
    %14 = vector.broadcast %cst_11 : f32 to vector<8x1xf32>
    %15 = arith.mulf %10, %14 : vector<8x1xf32>
    %cst_12 = arith.constant 0.00130208337 : f32
    %16 = vector.broadcast %cst_12 : f32 to vector<8x1xf32>
    %17 = arith.mulf %13, %16 : vector<8x1xf32>
    %18 = arith.mulf %15, %15 : vector<8x1xf32>
    %19 = arith.subf %17, %18 : vector<8x1xf32>
    %20 = vector.broadcast %15 : vector<8x1xf32> to vector<8x768xf32>
    %21 = arith.subf %6, %20 : vector<8x768xf32>
    %cst_13 = arith.constant 9.99999974E-6 : f32
    %22 = vector.broadcast %cst_13 : f32 to vector<8x1xf32>
    %23 = arith.addf %19, %22 : vector<8x1xf32>
    %24 = math.rsqrt %23 : vector<8x1xf32>
    %25 = vector.broadcast %24 : vector<8x1xf32> to vector<8x768xf32>
    %26 = arith.mulf %21, %25 : vector<8x768xf32>
    %27 = vector.broadcast %7 : vector<1x768xf32> to vector<8x768xf32>
    %28 = arith.mulf %26, %27 : vector<8x768xf32>
    %29 = vector.broadcast %8 : vector<1x768xf32> to vector<8x768xf32>
    %30 = arith.addf %28, %29 : vector<8x768xf32>
    %cst_14 = arith.constant 0.000000e+00 : f32
    %31 = vector.broadcast %cst_14 : f32 to vector<8x768xf32>
    %32 = arith.maximumf %30, %31 : vector<8x768xf32>
    %33 = arith.truncf %32 : vector<8x768xf32> to vector<8x768xbf16>
    %c0_15 = arith.constant 0 : index
    %c0_16 = arith.constant 0 : index
    %34 = vector.load %arg6[%c0_15, %c0_16] : memref<768x256xbf16, #tpu.memory_space<vmem>>, vector<768x256xbf16>
    %cst_17 = arith.constant dense<0.000000e+00> : vector<8x256xf32>
    %35 = tpu.matmul %33, %34, %cst_17 {dimension_numbers = #tpu.dot_dimension_numbers<[1], [0], [0], [1], [0, 0, 1, 1], [], []>} : vector<8x768xbf16>, vector<768x256xbf16>, vector<8x256xf32> -> vector<8x256xf32>
    %c0_18 = arith.constant 0 : index
    %c0_19 = arith.constant 0 : index
    %36 = vector.load %arg7[%c0_18, %c0_19] : memref<1x256xf32, #tpu.memory_space<vmem>>, vector<1x256xf32>
    %37 = vector.broadcast %36 : vector<1x256xf32> to vector<8x256xf32>
    %38 = arith.addf %35, %37 : vector<8x256xf32>
    %c0_20 = arith.constant 0 : index
    %c0_21 = arith.constant 0 : index
    %39 = vector.load %arg8[%c0_20, %c0_21] : memref<1x256xf32, #tpu.memory_space<vmem>>, vector<1x256xf32>
    %c0_22 = arith.constant 0 : index
    %c0_23 = arith.constant 0 : index
    %40 = vector.load %arg9[%c0_22, %c0_23] : memref<1x256xf32, #tpu.memory_space<vmem>>, vector<1x256xf32>
    %cst_24 = arith.constant dense<0.000000e+00> : vector<8xf32>
    %41 = vector.multi_reduction <add>, %38, %cst_24 [1] : vector<8x256xf32> to vector<8xf32>
    %42 = vector.shape_cast %41 : vector<8xf32> to vector<8x1xf32>
    %43 = arith.mulf %38, %38 : vector<8x256xf32>
    %cst_25 = arith.constant dense<0.000000e+00> : vector<8xf32>
    %44 = vector.multi_reduction <add>, %43, %cst_25 [1] : vector<8x256xf32> to vector<8xf32>
    %45 = vector.shape_cast %44 : vector<8xf32> to vector<8x1xf32>
    %cst_26 = arith.constant 0.00520833349 : f32
    %46 = vector.broadcast %cst_26 : f32 to vector<8x1xf32>
    %47 = arith.mulf %42, %46 : vector<8x1xf32>
    %cst_27 = arith.constant 0.00520833349 : f32
    %48 = vector.broadcast %cst_27 : f32 to vector<8x1xf32>
    %49 = arith.mulf %45, %48 : vector<8x1xf32>
    %50 = arith.mulf %47, %47 : vector<8x1xf32>
    %51 = arith.subf %49, %50 : vector<8x1xf32>
    %52 = vector.broadcast %47 : vector<8x1xf32> to vector<8x256xf32>
    %53 = arith.subf %38, %52 : vector<8x256xf32>
    %cst_28 = arith.constant 9.99999974E-6 : f32
    %54 = vector.broadcast %cst_28 : f32 to vector<8x1xf32>
    %55 = arith.addf %51, %54 : vector<8x1xf32>
    %56 = math.rsqrt %55 : vector<8x1xf32>
    %57 = vector.broadcast %56 : vector<8x1xf32> to vector<8x256xf32>
    %58 = arith.mulf %53, %57 : vector<8x256xf32>
    %59 = vector.broadcast %39 : vector<1x256xf32> to vector<8x256xf32>
    %60 = arith.mulf %58, %59 : vector<8x256xf32>
    %61 = vector.broadcast %40 : vector<1x256xf32> to vector<8x256xf32>
    %62 = arith.addf %60, %61 : vector<8x256xf32>
    %cst_29 = arith.constant 0.000000e+00 : f32
    %63 = vector.broadcast %cst_29 : f32 to vector<8x256xf32>
    %64 = arith.maximumf %62, %63 : vector<8x256xf32>
    %65 = arith.truncf %64 : vector<8x256xf32> to vector<8x256xbf16>
    %c0_30 = arith.constant 0 : index
    %c0_31 = arith.constant 0 : index
    %66 = vector.load %arg10[%c0_30, %c0_31] : memref<256x128xbf16, #tpu.memory_space<vmem>>, vector<256x128xbf16>
    %cst_32 = arith.constant dense<0.000000e+00> : vector<8x128xf32>
    %67 = tpu.matmul %65, %66, %cst_32 {dimension_numbers = #tpu.dot_dimension_numbers<[1], [0], [0], [1], [0, 0, 1, 1], [], []>} : vector<8x256xbf16>, vector<256x128xbf16>, vector<8x128xf32> -> vector<8x128xf32>
    %c0_33 = arith.constant 0 : index
    %c0_34 = arith.constant 0 : index
    %68 = vector.load %arg11[%c0_33, %c0_34] : memref<1x128xf32, #tpu.memory_space<vmem>>, vector<1x128xf32>
    %69 = vector.broadcast %68 : vector<1x128xf32> to vector<8x128xf32>
    %70 = arith.addf %67, %69 : vector<8x128xf32>
    %71 = math.tanh %70 : vector<8x128xf32>
    %c0_35 = arith.constant 0 : index
    %c0_36 = arith.constant 0 : index
    %72 = vector.load %arg12[%c0_35, %c0_36] : memref<8x128xf32, #tpu.memory_space<vmem>>, vector<8x128xf32>
    tpu.vector_store %arg12[%c0_35, %c0_36], %71 {strides = array<i32>} : memref<8x128xf32, #tpu.memory_space<vmem>>, vector<8x128xf32>,
    return
  }
  func.func @transform_0(%arg0: i32) -> (i32, i32) {
    %c0_i32 = arith.constant 0 : i32
    %c0_i32_0 = arith.constant 0 : i32
    return %arg0, %c0_i32 : i32, i32
  }
  func.func @transform_1(%arg0: i32) -> (i32, i32) {
    %c0_i32 = arith.constant 0 : i32
    %c0_i32_0 = arith.constant 0 : i32
    %c0_i32_1 = arith.constant 0 : i32
    return %c0_i32, %c0_i32_0 : i32, i32
  }
  func.func @transform_2(%arg0: i32) -> (i32, i32) {
    %c0_i32 = arith.constant 0 : i32
    %c0_i32_0 = arith.constant 0 : i32
    %c0_i32_1 = arith.constant 0 : i32
    return %c0_i32, %c0_i32_0 : i32, i32
  }
  func.func @transform_3(%arg0: i32) -> (i32, i32) {
    %c0_i32 = arith.constant 0 : i32
    %c0_i32_0 = arith.constant 0 : i32
    %c0_i32_1 = arith.constant 0 : i32
    return %c0_i32, %c0_i32_0 : i32, i32
  }
  func.func @transform_4(%arg0: i32) -> (i32, i32) {
    %c0_i32 = arith.constant 0 : i32
    %c0_i32_0 = arith.constant 0 : i32
    %c0_i32_1 = arith.constant 0 : i32
    return %c0_i32, %c0_i32_0 : i32, i32
  }
  func.func @transform_5(%arg0: i32) -> (i32, i32) {
    %c0_i32 = arith.constant 0 : i32
    %c0_i32_0 = arith.constant 0 : i32
    %c0_i32_1 = arith.constant 0 : i32
    return %c0_i32, %c0_i32_0 : i32, i32
  }
  func.func @transform_6(%arg0: i32) -> (i32, i32) {
    %c0_i32 = arith.constant 0 : i32
    %c0_i32_0 = arith.constant 0 : i32
    %c0_i32_1 = arith.constant 0 : i32
    return %c0_i32, %c0_i32_0 : i32, i32
  }
  func.func @transform_7(%arg0: i32) -> (i32, i32) {
    %c0_i32 = arith.constant 0 : i32
    %c0_i32_0 = arith.constant 0 : i32
    %c0_i32_1 = arith.constant 0 : i32
    return %c0_i32, %c0_i32_0 : i32, i32
  }
  func.func @transform_8(%arg0: i32) -> (i32, i32) {
    %c0_i32 = arith.constant 0 : i32
    %c0_i32_0 = arith.constant 0 : i32
    %c0_i32_1 = arith.constant 0 : i32
    return %c0_i32, %c0_i32_0 : i32, i32
  }
  func.func @transform_9(%arg0: i32) -> (i32, i32) {
    %c0_i32 = arith.constant 0 : i32
    %c0_i32_0 = arith.constant 0 : i32
    %c0_i32_1 = arith.constant 0 : i32
    return %c0_i32, %c0_i32_0 : i32, i32
  }
  func.func @transform_10(%arg0: i32) -> (i32, i32) {
    %c0_i32 = arith.constant 0 : i32
    %c0_i32_0 = arith.constant 0 : i32
    %c0_i32_1 = arith.constant 0 : i32
    return %c0_i32, %c0_i32_0 : i32, i32
  }
  func.func @transform_11(%arg0: i32) -> (i32, i32) {
    %c0_i32 = arith.constant 0 : i32
    %c0_i32_0 = arith.constant 0 : i32
    return %arg0, %c0_i32 : i32, i32
  }
}

</mosaic_0001>

<bundles_post_ra>
// kernel: actor_forward.1
= control target key start
LH: loop header
LB: loop body
LE: loop exit
PB: predicated region body
PF: predicated region fallthrough
CT: control target
= control target key end

     0   :  { %s3411_s0 = inlined_call_operand.hbm [shape: f32[24,48], index: 0, kind: input, shape index: {}]   ;;  %s3412_s1 = inlined_call_operand.hbm [shape: bf16[48,768], index: 1, kind: input, shape index: {}]   ;;  %s3413_s2 = inlined_call_operand.hbm [shape: f32[1,768], index: 2, kind: input, shape index: {}]   ;;  %s3414_s3 = inlined_call_operand.hbm [shape: f32[1,768], index: 3, kind: input, shape index: {}]   ;;  %s3415_s4 = inlined_call_operand.hbm [shape: f32[1,768], index: 4, kind: input, shape index: {}]   ;;  %s3416_s5 = inlined_call_operand.hbm [shape: bf16[768,256], index: 5, kind: input, shape index: {}]   ;;  %s3417_s6 = inlined_call_operand.hbm [shape: f32[1,256], index: 6, kind: input, shape index: {}]   ;;  %s3418_s7 = inlined_call_operand.vmem [shape: f32[1,256], index: 7, kind: input, shape index: {}]   ;;  %s3419_s8 = inlined_call_operand.vmem [shape: f32[1,256], index: 8, kind: input, shape index: {}]   ;;  %s3420_s9 = inlined_call_operand.hbm [shape: bf16[256,128], index: 9, kind: input, shape index: {}]   ;;  %s3421_s10 = inlined_call_operand.hbm [shape: f32[1,128], index: 10, kind: input, shape index: {}]   ;;  %s3422_s11 = inlined_call_operand.vmem [shape: f32[24,128], index: 11, kind: output, shape index: {}]  }
   0x1   :  { %3423 = sst [smem:[#allocation21_spill]] %s3412_s1 }
   0x2   :  { %3424 = sst [smem:[#allocation22_spill]] %s3414_s3 }
   0x3   :  { %3425 = sst [smem:[#allocation23_spill]] %s3416_s5 }
   0x4   :  { %16 = vsyncpa [#allocation3], 0 }
   0x5   :  { %18 = vsyncpa [#allocation3 + $0x1], 0 }
   0x6   :  { %19 = vsyncpa [#allocation5], 0 }
   0x7   :  { %20 = vsyncpa [#allocation8], 0 }
   0x8   :  { %21 = vsyncpa [#allocation11], 0 }
   0x9   :  { %22 = vsyncpa [#allocation14], 0  ;;  %s3129_s17 = smov 0   ;;  %s3131_s18 = smov 0  }
   0xa   :  { %s3133_s19 = smov 0   ;;  %s3135_s20 = smov 0  }
   0xb LB: > { %s3426_s1 = sld [smem:[#allocation21_spill]]  ;;  %s3153_s24 = sadd.s32 4294967295, %s3053_s20   ;;  %s3053_s20 = sphi %s3135_s20, %s3436_s20   ;;  %s3049_s19 = sphi %s3133_s19, %s3435_s19   ;;  %s3045_s18 = sphi %s3131_s18, %s3434_s18   ;;  %s3041_s17 = sphi %s3129_s17, %s3433_s17  }
   0xc   : > { %p1919_p0 = scmp.ge.s32.totalorder %s3053_s20, 1  ;;  %p49_p1 = scmp.eq.s32.totalorder %s3153_s24, 0 }
   0xd   : > { %p295_p2 = scmp.lt.s32.totalorder %s3053_s20, 4  ;;  %s3055_s26 = smov [#allocation4]  }
   0xe   : > { %s308_s27 = sshll.u32 %s3055_s26, 4  ;;  %s3428_s3 = sld [smem:[#allocation22_spill]]  ;;  %s309_s27 = int_to_ptr.vmem [resolvable:$true] %s308_s27 }
   0xf   : > { %p3158_p3 = pnand %p1919_p0, %p295_p2  ;;  %s3430_s5 = sld [smem:[#allocation23_spill]] }
  0x10   : > { %s3056_s16 = smov [#allocation7]   ;;  %s3057_s22 = smov 384  }
  0x11   : > { %s306_s23 = sshll.u32 %s3426_s1, 4  ;;  %p2634_p4 = pneg %p3158_p3  ;;  %s307_s23 = int_to_ptr.hbm [resolvable:$true] %s306_s23 }
  0x12   : > { %s335_s21 = sshll.u32 %s3056_s16, 4  ;;  %s3058_s26 = smov 24   ;;  %s336_s21 = int_to_ptr.vmem [resolvable:$true] %s335_s21 }
  0x13   : > { %p3169_p5 = pnand %p2634_p4, %p49_p1  ;;  %s3059_s28 = smov [#allocation10]  }
  0x14   : > { %s333_s30 = sshll.u32 %s3428_s3, 4  ;;  %s358_s29 = sshll.u32 %s3059_s28, 4  ;;  %s334_s30 = int_to_ptr.hbm [resolvable:$true] %s333_s30  ;;  %s359_s29 = int_to_ptr.vmem [resolvable:$true] %s358_s29 }
  0x15   : > { %s356_s15 = sshll.u32 %s3430_s5, 4  ;;  %s388_s13 = sshll.u32 %s3420_s9, 4  ;;  %s357_s15 = int_to_ptr.hbm [resolvable:$true] %s356_s15  ;;  %s389_s13 = int_to_ptr.hbm [resolvable:$true] %s388_s13 }
  0x16   : > { %2637 = dma.hbm_to_vmem [thread:$0]  (!%p3169_p5), %s307_s23, 2304, %s309_s27, [#allocation5], %s3057_s22, %s3057_s22, %s3058_s26  }
  0x17   : > { %2643 = dma.hbm_to_vmem [thread:$0]  (!%p3169_p5), %s334_s30, 96, %s336_s21, [#allocation8]  }
  0x18   : > { %s3060_s14 = smov 128   ;;  %s3061_s5 = smov 8  }
  0x19   : > { %2649 = dma.hbm_to_vmem [thread:$0]  (!%p3169_p5), %s357_s15, 12288, %s359_s29, [#allocation11], %s3060_s14, %s3060_s14, %s3061_s5  }
  0x1a   : > { %s3062_s16 = smov [#allocation13]   ;;  %s3063_s27 = smov 64  }
  0x1b   : > { %s390_s23 = sshll.u32 %s3062_s16, 4  ;;  %s3064_s22 = smov 4   ;;  %s391_s23 = int_to_ptr.vmem [resolvable:$true] %s390_s23 }
  0x1c   : > { %2655 = dma.hbm_to_vmem [thread:$0]  (!%p3169_p5), %s389_s13, 2048, %s391_s23, [#allocation14], %s3063_s27, %s3063_s27, %s3064_s22  }
  0x1d   : > { %s321_s26 = sshll.u32 %s3413_s2, 4  ;;  %s3065_s1 = smov [#allocation6]   ;;  %s322_s26 = int_to_ptr.hbm [resolvable:$true] %s321_s26 }
  0x1e   : > { %s323_s3 = sshll.u32 %s3065_s1, 4  ;;  %s345_s15 = sshll.u32 %s3415_s4, 4  ;;  %s324_s3 = int_to_ptr.vmem [resolvable:$true] %s323_s3  ;;  %s346_s15 = int_to_ptr.hbm [resolvable:$true] %s345_s15 }
  0x1f   : > { %2640 = dma.hbm_to_vmem [thread:$0]  (!%p3169_p5), %s322_s26, 96, %s324_s3, [#allocation5]  }
  0x20   : > { %s3066_s29 = smov [#allocation9]   ;;  %s371_s23 = sshll.u32 %s3417_s6, 4  ;;  %s372_s23 = int_to_ptr.hbm [resolvable:$true] %s371_s23 }
  0x21   : > { %s347_s13 = sshll.u32 %s3066_s29, 4  ;;  %s403_s30 = sshll.u32 %s3421_s10, 4  ;;  %s348_s13 = int_to_ptr.vmem [resolvable:$true] %s347_s13  ;;  %s404_s30 = int_to_ptr.hbm [resolvable:$true] %s403_s30 }
  0x22   : > { %2646 = dma.hbm_to_vmem [thread:$0]  (!%p3169_p5), %s346_s15, 96, %s348_s13, [#allocation8]  }
  0x23   : > { %s3067_s21 = smov [#allocation12]   ;;  %s3068_s1 = smov [#allocation15]  }
  0x24   : > { %s373_s26 = sshll.u32 %s3067_s21, 4  ;;  %s405_s3 = sshll.u32 %s3068_s1, 4  ;;  %s374_s26 = int_to_ptr.vmem [resolvable:$true] %s373_s26  ;;  %s406_s3 = int_to_ptr.vmem [resolvable:$true] %s405_s3 }
  0x25   : > { %2652 = dma.hbm_to_vmem [thread:$0]  (!%p3169_p5), %s372_s23, 32, %s374_s26, [#allocation11]  }
  0x26   : > { %2658 = dma.hbm_to_vmem [thread:$0]  (!%p3169_p5), %s404_s30, 16, %s406_s3, [#allocation14]  }
  0x27   : > { %s3208_s28 = sadd.s32 1, %s3053_s20   ;;  %s35_s15 = sadd.s32 1, %s3049_s19 }
  0x28   : > { %s32_s5 = ssub.s32 %s3053_s20, %s3208_s28  ;;  %p42_p7 = scmp.ne.s32.totalorder %s3049_s19, %s3045_s18 }
  0x29   : > { %p33_p6 = scmp.eq.s32.totalorder %s32_s5, 0  ;;  %p43_p8 = scmp.eq.s32.totalorder %s3053_s20, 0 }
  0x2a   : > { %p48_p9 = scmp.ne.s32.totalorder %s3045_s18, %s3041_s17  ;;  %p2671_p11 = scmp.lt.s32.totalorder %s3053_s20, 3 }
  0x2b   : > { %s3219_s29 = scalar_select %p33_p6, %s3049_s19, %s35_s15  }
  0x2c   : > { %p3223_p10 = por %p49_p1, %p48_p9  ;;  %s416_s14 = sand.u32 1, %s3049_s19  }
  0x2d   : > { %s1930_s12 = sshll.u32 %s3053_s20, 3  ;;  %p44_p12 = por %p43_p8, %p42_p7 }
  0x2e   : > { %s1929_s16 = sshll.u32 %s416_s14, 3  ;;  %s424_s22 = scalar_lea.hbm %s3411_s0, %s1930_s12 }
  0x2f   : > { %s426_s30 = sshll.u32 %s424_s22, 4  ;;  %s420_s21 = scalar_lea.vmem [#allocation2], %s1929_s16  ;;  %s427_s30 = int_to_ptr.hbm [resolvable:$true] %s426_s30 }
  0x30   : > { %s428_s26 = sshll.u32 %s420_s21, 4  ;;  %p3233_p13 = pnand %p2671_p11, %p44_p12  ;;  %s429_s26 = int_to_ptr.vmem [resolvable:$true] %s428_s26 }
  0x31   : > { %s417_s1 = scalar_lea.sflag [#allocation3], %s416_s14  ;;  %s2973_s3 = sshra.s32 %s427_s30, 4  ;;  %s2974_s3 = int_to_ptr.hbm [resolvable:$true] %s2973_s3 }
  0x32   : > { %s2975_s20 = scalar_lea.hbm %s2974_s3, 8  ;;  %p2977_p2 = pneg %p3233_p13 }
  0x33   : > { %p2976_p0 = scmp.ne.s32.totalorder %s2974_s3, %s2975_s20  ;;  %s2980_s12 = scalar_lea.hbm %s3411_s0, 24 }
  0x34   : > { %p2981_p6 = scmp.lt.s32.totalorder %s2974_s3, %s3411_s0  ;;  %p2982_p7 = scmp.lt.s32.totalorder %s2980_s12, %s2975_s20 }
  0x35   : > { %p2978_p4 = pnand %p2977_p2, %p2976_p0 }
  0x36   : > { %p2983_p8 = por %p2982_p7, %p2981_p6 }
  0x37   : > { %p2979_p5 = pneg %p2978_p4 }
  0x39   : > { %p2984_p9 = pnand %p2983_p8, %p2979_p5 }
  0x3b   : > { %2987 = shalt.err (!%p2984_p9)
}
  0x3c   : > { %2662 = dma.hbm_to_vmem [thread:$0]  (!%p3233_p13), %s427_s30, 128, %s429_s26, %s417_s1  }
  0x3d   : > { %437 = sbr.rel (%p3158_p3) target bundleno = 872 (0x368), region = 64  ;;  %s439_s14 = sand.u32 (!%p3158_p3), 1, %s3045_s18  }
  0x3e   : > { %s3250_s27 = sshll.u32 (!%p3158_p3), %s439_s14, 3  ;;  %s440_s22 = scalar_lea.sflag (!%p3158_p3), [#allocation3], %s439_s14 }
  0x3f   : > { %s443_s21 = scalar_lea.vmem (!%p3158_p3), [#allocation2], %s3250_s27 }
  0x42   : > { %3020 = dma.done.wait (%p3223_p10), %s440_s22, 128  }
  0x43   : > { %3022 = vsyncadd (%p3223_p10), %s440_s22, 4294967168 }
  0x44   : > { %3024 = dma.done.wait (%p49_p1), [#allocation5], 2400  }
  0x45   : > { %3026 = vsyncadd (%p49_p1), [#allocation5], 4294964896 }
  0x46   : > { %3028 = dma.done.wait (%p49_p1), [#allocation8], 192  }
  0x47   : > { %3030 = vsyncadd (%p49_p1), [#allocation8], 4294967104 }
  0x48   : > { %3032 = dma.done.wait (%p49_p1), [#allocation11], 12320  }
  0x49   : > { %3034 = vsyncadd (%p49_p1), [#allocation11], 4294954976 }
  0x4a   : > { %3036 = dma.done.wait (%p49_p1), [#allocation14], 2064  }
  0x4b   : > { %3038 = vsyncadd (%p49_p1), [#allocation14], 4294965232  ;;  %v1992_v0 = vld [vmem:[#allocation4 + $0x60] sm:$0xf]  ;;  %v2485_v1 = vld [vmem:[#allocation4 + $0x74] sm:$0xf0] }
  0x4c   : > { %v2482_v2 = vld [vmem:[#allocation4 + $0x64] sm:$0xf]  ;;  %v1993_v3 = vor.u32 %v2485_v1, %v1992_v0  ;;  %v1994_v4 = vld [vmem:[#allocation4 + $0x78] sm:$0xf0]  ;;  %v2000_v5 = vld [vmem:[#allocation4 + $0x68] sm:$0xf] }
  0x4d   : > { %v2486_v6 = vld [vmem:[#allocation4 + $0x7c] sm:$0xf0]  ;;  %v1997_v7 = vor.u32 %v2482_v2, %v1994_v4  ;;  %v2483_v9 = vld [vmem:[#allocation4 + $0x6c] sm:$0xf]  ;;  %v2002_v10 = vld [vmem:[#allocation4 + $0x80] sm:$0xf0] }
  0x4e   : > { %v2001_v8 = vor.u32 %v2486_v6, %v2000_v5  ;;  %v1968_v11 = vld [vmem:[#allocation4 + $0x30] sm:$0xf]  ;;  %660 = vmatpush.bf16.msra.mxu0 %v1993_v3  ;;  %v2005_v12 = vor.u32 %v2483_v9, %v2002_v10  ;;  %v2479_v13 = vld [vmem:[#allocation4 + $0x44] sm:$0xf0]  ;;  %v2476_v14 = vld [vmem:[#allocation4 + $0x34] sm:$0xf] }
  0x4f   : > { %v1970_v15 = vld [vmem:[#allocation4 + $0x48] sm:$0xf0]  ;;  %673 = vmatpush.bf16.msra.mxu1 %v1997_v7  ;;  %v1969_v16 = vor.u32 %v2479_v13, %v1968_v11  ;;  %v1976_v18 = vld [vmem:[#allocation4 + $0x38] sm:$0xf]  ;;  %v2480_v19 = vld [vmem:[#allocation4 + $0x4c] sm:$0xf0] }
  0x50   : > { %686 = vmatpush.bf16.msra.mxu2 %v2001_v8  ;;  %v1973_v17 = vor.u32 %v2476_v14, %v1970_v15  ;;  %v2477_v20 = vld [vmem:[#allocation4 + $0x3c] sm:$0xf]  ;;  %699 = vmatpush.bf16.msra.mxu3 %v2005_v12  ;;  %v1977_v21 = vor.u32 %v2480_v19, %v1976_v18  ;;  %v1978_v22 = vld [vmem:[#allocation4 + $0x50] sm:$0xf0]  ;;  %v1944_v23 = vld [vmem:[#allocation4] sm:$0xf] }
  0x51   : > { %v2473_v24 = vld [vmem:[#allocation4 + $0x14] sm:$0xf0]  ;;  %v1981_v25 = vor.u32 %v2477_v20, %v1978_v22  ;;  %v2470_v26 = vld [vmem:[#allocation4 + $0x4] sm:$0xf]  ;;  %v1946_v27 = vld [vmem:[#allocation4 + $0x18] sm:$0xf0] }
  0x52   : > { %v1952_v28 = vld [vmem:[#allocation4 + $0x8] sm:$0xf]  ;;  %661 = vmatpush.bf16.msra.mxu0 %v1969_v16  ;;  %v1945_v29 = vor.u32 %v2473_v24, %v1944_v23  ;;  %v2474_v30 = vld [vmem:[#allocation4 + $0x1c] sm:$0xf0]  ;;  %v2471_v31 = vld [vmem:[#allocation4 + $0xc] sm:$0xf]  ;;  %v1949_v33 = vor.u32 %v2470_v26, %v1946_v27 }
  0x53   : > { %v1954_v32 = vld [vmem:[#allocation4 + $0x20] sm:$0xf0]  ;;  %674 = vmatpush.bf16.msra.mxu1 %v1973_v17  ;;  %v1953_v34 = vor.u32 %v2474_v30, %v1952_v28  ;;  %v527_v35 = vld [vmem:[%s443_s21] sm:$0xff]  ;;  %v2487_v37 = vld [vmem:[#allocation4 + $0x84] sm:$0xf0]  ;;  %vm651_vm0 = vcmask 392192  }
  0x54   : > { %687 = vmatpush.bf16.msra.mxu2 %v1977_v21  ;;  %v2008_v36 = vld [vmem:[#allocation4 + $0x70] sm:$0xf]  ;;  %700 = vmatpush.bf16.msra.mxu3 %v1981_v25  ;;  %v1957_v38 = vor.u32 %v2471_v31, %v1954_v32  ;;  %v2484_v40 = vld [vmem:[#allocation4 + $0x74] sm:$0xf]  ;;  %v2010_v41 = vld [vmem:[#allocation4 + $0x88] sm:$0xf0]  ;;  %v528_v42 = vpack.c.bf16 %v527_v35, %v527_v35 }
  0x55   : > { %v2009_v39 = vor.u32 %v2487_v37, %v2008_v36  ;;  %v2013_v43 = vor.u32 %v2484_v40, %v2010_v41  ;;  %v1984_v44 = vld [vmem:[#allocation4 + $0x40] sm:$0xf]  ;;  %v2481_v45 = vld [vmem:[#allocation4 + $0x54] sm:$0xf0]  ;;  %v2478_v46 = vld [vmem:[#allocation4 + $0x44] sm:$0xf] }
  0x56   : > { %662 = vmatpush.bf16.msra.mxu0 %v1945_v29  ;;  %v1986_v47 = vld [vmem:[#allocation4 + $0x58] sm:$0xf0]  ;;  %v1985_v48 = vor.u32 %v2481_v45, %v1984_v44  ;;  %v1960_v50 = vld [vmem:[#allocation4 + $0x10] sm:$0xf]  ;;  %v2475_v51 = vld [vmem:[#allocation4 + $0x24] sm:$0xf0] }
  0x57   : > { %675 = vmatpush.bf16.msra.mxu1 %v1949_v33  ;;  %v1989_v49 = vor.u32 %v2478_v46, %v1986_v47  ;;  %v2472_v52 = vld [vmem:[#allocation4 + $0x14] sm:$0xf]  ;;  %v1962_v53 = vld [vmem:[#allocation4 + $0x28] sm:$0xf0]  ;;  %v1961_v54 = vor.u32 %v2475_v51, %v1960_v50  ;;  %v2503_v61 = vld [vmem:[#allocation10 + $0x74] sm:$0xf0] }
  0x58   : > { %688 = vmatpush.bf16.msra.mxu2 %v1953_v34  ;;  %701 = vmatpush.bf16.msra.mxu3 %v1957_v38  ;;  %v1965_v55 = vor.u32 %v2472_v52, %v1962_v53  ;;  %v3281_v56 = vld [vmem:[#allocation6] sm:$0x3f]  ;;  %v2519_v1 = vld [vmem:[#allocation10 + $0xf4] sm:$0xf0]  ;;  %v2070_v9 = vld [vmem:[#allocation10 + $0x60] sm:$0xf] }
  0x59   : > { %2014 = vmatmul.msk.bf16.vlgmr.msra.gmra.mxu0 %vm651_vm0, %v528_v42  ;;  %v549_v57 = vperm.slane %v3281_v56, 0  ;;  %v550_v58 = vperm.slane %v3281_v56, 1  ;;  %v551_v59 = vperm.slane %v3281_v56, 2  ;;  %v2078_v60 = vld [vmem:[#allocation10 + $0x70] sm:$0xf]  ;;  %v552_v46 = vperm.slane %v3281_v56, 3 }
  0x5a   : > { %712 = vmatpush.bf16.msrb.mxu0 %v2009_v39  ;;  %2015 = vmatmul.msk.bf16.vlgmr.msra.gmra.mxu1 %vm651_vm0, %v528_v42  ;;  %v2142_v62 = vld [vmem:[#allocation10 + $0xf0] sm:$0xf]  ;;  %v2079_v0 = vor.u32 %v2503_v61, %v2078_v60  ;;  %v2535_v3 = vld [vmem:[#allocation10 + $0x174] sm:$0xf0]  ;;  %v2501_v11 = vld [vmem:[#allocation10 + $0x64] sm:$0xf0] }
  0x5b   : > { %725 = vmatpush.bf16.msrb.mxu1 %v2013_v43  ;;  %2016 = vmatmul.msk.bf16.vlgmr.msra.gmra.mxu2 %vm651_vm0, %v528_v42  ;;  %v2206_v2 = vld [vmem:[#allocation10 + $0x170] sm:$0xf]  ;;  %v2143_v5 = vor.u32 %v2519_v1, %v2142_v62  ;;  %v2551_v8 = vld [vmem:[#allocation10 + $0x1f4] sm:$0xf0]  ;;  %v2134_v12 = vld [vmem:[#allocation10 + $0xe0] sm:$0xf]  ;;  %v2071_v14 = vor.u32 %v2501_v11, %v2070_v9 }
  0x5c   : > { %2017 = vmatmul.msk.bf16.vlgmr.msra.gmra.mxu3 %vm651_vm0, %v528_v42  ;;  %v2207_v6 = vor.u32 %v2535_v3, %v2206_v2  ;;  %v2270_v7 = vld [vmem:[#allocation10 + $0x1f0] sm:$0xf]  ;;  %1414 = vmatpush.bf16.msrb.mxu2 %v2079_v0  ;;  %v2517_v13 = vld [vmem:[#allocation10 + $0xe4] sm:$0xf0]  ;;  %v2198_v16 = vld [vmem:[#allocation10 + $0x160] sm:$0xf] }
  0x5d   : > { %v2271_v10 = vor.u32 %v2551_v8, %v2270_v7  ;;  %1427 = vmatpush.bf16.msrb.mxu3 %v2143_v5  ;;  %v2135_v15 = vor.u32 %v2517_v13, %v2134_v12  ;;  %v2533_v17 = vld [vmem:[#allocation10 + $0x164] sm:$0xf0]  ;;  %v2262_v18 = vld [vmem:[#allocation10 + $0x1e0] sm:$0xf]  ;;  %v2062_v21 = vld [vmem:[#allocation10 + $0x50] sm:$0xf] }
  0x5e   : > { %713 = vmatpush.bf16.msrb.mxu0 %v1985_v48  ;;  %v2199_v19 = vor.u32 %v2533_v17, %v2198_v16  ;;  %v2549_v20 = vld [vmem:[#allocation10 + $0x1e4] sm:$0xf0]  ;;  %v2499_v22 = vld [vmem:[#allocation10 + $0x54] sm:$0xf0]  ;;  %v2126_v24 = vld [vmem:[#allocation10 + $0xd0] sm:$0xf] }
  0x5f   : > { %726 = vmatpush.bf16.msrb.mxu1 %v1989_v49  ;;  %v2263_v23 = vor.u32 %v2549_v20, %v2262_v18  ;;  %v2515_v25 = vld [vmem:[#allocation10 + $0xd4] sm:$0xf0]  ;;  %v2190_v26 = vld [vmem:[#allocation10 + $0x150] sm:$0xf]  ;;  %v2063_v28 = vor.u32 %v2499_v22, %v2062_v21  ;;  %v2054_v36 = vld [vmem:[#allocation10 + $0x40] sm:$0xf] }
  0x60   : > { %1415 = vmatpush.bf16.msrb.mxu2 %v2071_v14  ;;  %v2531_v29 = vld [vmem:[#allocation10 + $0x154] sm:$0xf0]  ;;  %v2254_v30 = vld [vmem:[#allocation10 + $0x1d0] sm:$0xf]  ;;  %v2127_v34 = vor.u32 %v2515_v25, %v2126_v24  ;;  %v2497_v37 = vld [vmem:[#allocation10 + $0x44] sm:$0xf0] }
  0x61   : > { %v2547_v31 = vld [vmem:[#allocation10 + $0x1d4] sm:$0xf0]  ;;  %1428 = vmatpush.bf16.msrb.mxu3 %v2135_v15  ;;  %v2191_v35 = vor.u32 %v2531_v29, %v2190_v26  ;;  %v2118_v38 = vld [vmem:[#allocation10 + $0xc0] sm:$0xf]  ;;  %v2529_v44 = vld [vmem:[#allocation10 + $0x144] sm:$0xf0]  ;;  %v2055_v50 = vor.u32 %v2497_v37, %v2054_v36 }
  0x62   : > { %714 = vmatpush.bf16.msrb.mxu0 %v1961_v54  ;;  %v2255_v41 = vor.u32 %v2547_v31, %v2254_v30  ;;  %v2182_v43 = vld [vmem:[#allocation10 + $0x140] sm:$0xf]  ;;  %v2545_v49 = vld [vmem:[#allocation10 + $0x1c4] sm:$0xf0]  ;;  %v553_v54 = vperm.slane %v3281_v56, 4  ;;  %v554_v61 = vperm.slane %v3281_v56, 5 }
  0x63   : > { %727 = vmatpush.bf16.msrb.mxu1 %v1965_v55  ;;  %v2246_v48 = vld [vmem:[#allocation10 + $0x1c0] sm:$0xf]  ;;  %v2183_v53 = vor.u32 %v2529_v44, %v2182_v43  ;;  %v2046_v17 = vld [vmem:[#allocation10 + $0x30] sm:$0xf]  ;;  %v2495_v18 = vld [vmem:[#allocation10 + $0x34] sm:$0xf0] }
  0x64   : > { %1416 = vmatpush.bf16.msrb.mxu2 %v2063_v28  ;;  %v2247_v55 = vor.u32 %v2545_v49, %v2246_v48  ;;  %v2047_v20 = vor.u32 %v2495_v18, %v2046_v17  ;;  %v2511_v21 = vld [vmem:[#allocation10 + $0xb4] sm:$0xf0]  ;;  %v2174_v22 = vld [vmem:[#allocation10 + $0x130] sm:$0xf]  ;;  %v2038_v29 = vld [vmem:[#allocation10 + $0x20] sm:$0xf] }
  0x65   : > { %1429 = vmatpush.bf16.msrb.mxu3 %v2127_v34  ;;  %v2238_v26 = vld [vmem:[#allocation10 + $0x1b0] sm:$0xf]  ;;  %v2543_v28 = vld [vmem:[#allocation10 + $0x1b4] sm:$0xf0]  ;;  %v2493_v31 = vld [vmem:[#allocation10 + $0x24] sm:$0xf0] }
  0x66   : > { %1440 = vmatpush.bf16.msra.mxu0 %v2207_v6  ;;  %v2239_v30 = vor.u32 %v2543_v28, %v2238_v26  ;;  %v2509_v34 = vld [vmem:[#allocation10 + $0xa4] sm:$0xf0]  ;;  %v2166_v37 = vld [vmem:[#allocation10 + $0x120] sm:$0xf]  ;;  %v2030_v43 = vld [vmem:[#allocation10 + $0x10] sm:$0xf] }
  0x67   : > { %1453 = vmatpush.bf16.msra.mxu1 %v2271_v10  ;;  %v2491_v44 = vld [vmem:[#allocation10 + $0x14] sm:$0xf0]  ;;  %v2158_v49 = vld [vmem:[#allocation10 + $0x110] sm:$0xf]  ;;  %v2144_v17 = vld [vmem:[#allocation10 + $0xf8] sm:$0xf0] }
  0x68   : > { %1417 = vmatpush.bf16.msrb.mxu2 %v2055_v50  ;;  %v2507_v48 = vld [vmem:[#allocation10 + $0x94] sm:$0xf0]  ;;  %v2326_v18 = vld [vmem:[#allocation10 + $0x260] sm:$0xf]  ;;  %v2072_v26 = vld [vmem:[#allocation10 + $0x68] sm:$0xf0] }
  0x69   : > { %2018 = vmatmul.msk.bf16.vlgmr.msrb.gmra.mxu0 %vm651_vm0, %v528_v42  ;;  %v2523_v50 = vld [vmem:[#allocation10 + $0x114] sm:$0xf0]  ;;  %v2516_v28 = vld [vmem:[#allocation10 + $0xe4] sm:$0xf]  ;;  %p522_p1 = scmp.lt.s32.totalorder %s3153_s24, 2 }
  0x6a   : > { %2019 = vmatmul.msk.bf16.vlgmr.msrb.gmra.mxu1 %vm651_vm0, %v528_v42  ;;  %1441 = vmatpush.bf16.msra.mxu0 %v2199_v19  ;;  %v2513_v42 = vld [vmem:[#allocation10 + $0xc4] sm:$0xf0]  ;;  %v2110_v19 = vld [vmem:[#allocation10 + $0xb0] sm:$0xf] }
  0x6b   : > { %1454 = vmatpush.bf16.msra.mxu1 %v2263_v23  ;;  %v2119_v52 = vor.u32 %v2513_v42, %v2118_v38  ;;  %v2527_v23 = vld [vmem:[#allocation10 + $0x134] sm:$0xf0]  ;;  %v2111_v24 = vor.u32 %v2511_v21, %v2110_v19  ;;  %v2525_v38 = vld [vmem:[#allocation10 + $0x124] sm:$0xf0]  ;;  %s3438_s24 = smov (!%p522_p1, %s3153_s24), 2 }
  0x6c   : > { %v2175_v25 = vor.u32 %v2527_v23, %v2174_v22  ;;  %1418 = vmatpush.bf16.msrb.mxu2 %v2047_v20  ;;  %v2565_v19 = vld [vmem:[#allocation10 + $0x264] sm:$0xf0]  ;;  %v2390_v22 = vld [vmem:[#allocation10 + $0x2e0] sm:$0xf]  ;;  %s1941_s17 = sshll.u32 %s3438_s24, 3 }
  0x6d   : > { %1430 = vmatpush.bf16.msrb.mxu3 %v2119_v52  ;;  %v2159_v52 = vor.u32 %v2523_v50, %v2158_v49  ;;  %v2327_v21 = vor.u32 %v2565_v19, %v2326_v18  ;;  %v2581_v23 = vld [vmem:[#allocation10 + $0x2e4] sm:$0xf0]  ;;  %v2508_v18 = vld [vmem:[#allocation10 + $0xa4] sm:$0xf]  ;;  %v2104_v19 = vld [vmem:[#allocation10 + $0xa8] sm:$0xf0]  ;;  %s525_s20 = scalar_lea.vmem %s3422_s11, %s1941_s17 }
  0x6e   : > { %1442 = vmatpush.bf16.msra.mxu0 %v2191_v35  ;;  %v2039_v35 = vor.u32 %v2493_v31, %v2038_v29  ;;  %v2136_v29 = vld [vmem:[#allocation10 + $0xe8] sm:$0xf0]  ;;  %v2577_v50 = vld [vmem:[#allocation10 + $0x2c4] sm:$0xf0] }
  0x6f   : > { %1455 = vmatpush.bf16.msra.mxu1 %v2255_v41  ;;  %v2541_v41 = vld [vmem:[#allocation10 + $0x1a4] sm:$0xf0]  ;;  %v2139_v31 = vor.u32 %v2516_v28, %v2136_v29  ;;  %v2490_v28 = vld [vmem:[#allocation10 + $0x14] sm:$0xf]  ;;  %v2032_v29 = vld [vmem:[#allocation10 + $0x18] sm:$0xf0] }
  0x70   : > { %1419 = vmatpush.bf16.msrb.mxu2 %v2039_v35  ;;  %v2382_v35 = vld [vmem:[#allocation10 + $0x2d0] sm:$0xf] }
  0x71   : > { %1431 = vmatpush.bf16.msrb.mxu3 %v2111_v24  ;;  %v2500_v24 = vld [vmem:[#allocation10 + $0x64] sm:$0xf] }
  0x72   : > { %1443 = vmatpush.bf16.msra.mxu0 %v2183_v53  ;;  %v2222_v53 = vld [vmem:[#allocation10 + $0x190] sm:$0xf] }
  0x73   : > { %1456 = vmatpush.bf16.msra.mxu1 %v2247_v55 }
  0x76   : > { %1444 = vmatpush.bf16.msra.mxu0 %v2175_v25  ;;  %v2391_v25 = vor.u32 %v2581_v23, %v2390_v22  ;;  %v2555_v22 = vld [vmem:[#allocation10 + $0x214] sm:$0xf0]  ;;  %v2350_v23 = vld [vmem:[#allocation10 + $0x290] sm:$0xf] }
  0x77   : > { %1457 = vmatpush.bf16.msra.mxu1 %v2239_v30  ;;  %v2075_v30 = vor.u32 %v2500_v24, %v2072_v26  ;;  %v2571_v24 = vld [vmem:[#allocation10 + $0x294] sm:$0xf0]  ;;  %v2107_v26 = vor.u32 %v2508_v18, %v2104_v19  ;;  %v2534_v19 = vld [vmem:[#allocation10 + $0x174] sm:$0xf] }
  0xd6   : > { %v664_v63 = vpop.f32.mrf.mxu0 }
  0xd7   : > { %v677_v4 = vpop.f32.mrf.mxu1  ;;  %v3286_v27 = vadd.f32 %v664_v63, %v549_v57 }
  0xd8   : > { %v3288_v32 = vadd.f32 %v677_v4, %v550_v58 }
  0xd9   : > { %v742_v57 = vmul.f32 %v3286_v27, %v3286_v27 }
  0xda   : > { %v735_v51 = vadd.f32 %v3288_v32, %v3286_v27  ;;  %v743_v58 = vmul.f32 %v3288_v32, %v3288_v32 }
  0xdc   : > { %v748_v2 = vadd.f32 %v743_v58, %v742_v57  ;;  %v2022_v57 = vld [vmem:[#allocation10] sm:$0xf]  ;;  %v2489_v58 = vld [vmem:[#allocation10 + $0x4] sm:$0xf0] }
  0xde   : > { %v690_v33 = vpop.f32.mrf.mxu2  ;;  %v666_v40 = vpop.f32.mrf.mxu0 }
  0xdf   : > { %v703_v39 = vpop.f32.mrf.mxu3  ;;  %v3290_v45 = vadd.f32 %v690_v33, %v551_v59  ;;  %v679_v47 = vpop.f32.mrf.mxu1  ;;  %v2102_v33 = vld [vmem:[#allocation10 + $0xa0] sm:$0xf]  ;;  %v2167_v40 = vor.u32 %v2525_v38, %v2166_v37  ;;  %v2579_v37 = vld [vmem:[#allocation10 + $0x2d4] sm:$0xf0]  ;;  %v2498_v38 = vld [vmem:[#allocation10 + $0x54] sm:$0xf] }
  0xe0   : > { %v3301_v60 = vadd.f32 %v703_v39, %v552_v46  ;;  %v2103_v36 = vor.u32 %v2509_v34, %v2102_v33  ;;  %v2230_v39 = vld [vmem:[#allocation10 + $0x1a0] sm:$0xf]  ;;  %v2094_v46 = vld [vmem:[#allocation10 + $0x90] sm:$0xf]  ;;  %v2031_v47 = vor.u32 %v2491_v44, %v2030_v43  ;;  %v2563_v34 = vld [vmem:[#allocation10 + $0x254] sm:$0xf0] }
  0xe1   : > { %v736_v59 = vadd.f32 %v735_v51, %v3290_v45  ;;  %v744_v62 = vmul.f32 %v3290_v45, %v3290_v45  ;;  %v2231_v42 = vor.u32 %v2541_v41, %v2230_v39  ;;  %1445 = vmatpush.bf16.msra.mxu0 %v2167_v40  ;;  %v2095_v51 = vor.u32 %v2507_v48, %v2094_v46  ;;  %v2318_v33 = vld [vmem:[#allocation10 + $0x250] sm:$0xf]  ;;  %v2064_v39 = vld [vmem:[#allocation10 + $0x58] sm:$0xf0]  ;;  %v2310_v46 = vld [vmem:[#allocation10 + $0x240] sm:$0xf] }
  0xe2   : > { %v745_v56 = vmul.f32 %v3301_v60, %v3301_v60  ;;  %1432 = vmatpush.bf16.msrb.mxu3 %v2103_v36  ;;  %1420 = vmatpush.bf16.msrb.mxu2 %v2031_v47  ;;  %v2319_v36 = vor.u32 %v2563_v34, %v2318_v33  ;;  %v2383_v40 = vor.u32 %v2579_v37, %v2382_v35  ;;  %v2128_v43 = vld [vmem:[#allocation10 + $0xd8] sm:$0xf0]  ;;  %v2561_v47 = vld [vmem:[#allocation10 + $0x244] sm:$0xf0]  ;;  %v2374_v48 = vld [vmem:[#allocation10 + $0x2c0] sm:$0xf] }
  0xe3   : > { %v737_v5 = vadd.f32 %v736_v59, %v3301_v60  ;;  %v749_v7 = vadd.f32 %v748_v2, %v744_v62  ;;  %1458 = vmatpush.bf16.msra.mxu1 %v2231_v42  ;;  %v2086_v59 = vld [vmem:[#allocation10 + $0x80] sm:$0xf]  ;;  %v2505_v62 = vld [vmem:[#allocation10 + $0x84] sm:$0xf0]  ;;  %v2067_v41 = vor.u32 %v2498_v38, %v2064_v39  ;;  %v2514_v42 = vld [vmem:[#allocation10 + $0xd4] sm:$0xf]  ;;  %v2311_v49 = vor.u32 %v2561_v47, %v2310_v46 }
  0xe4   : > { %v2131_v44 = vor.u32 %v2514_v42, %v2128_v43  ;;  %v2351_v34 = vor.u32 %v2571_v24, %v2350_v23  ;;  %v2342_v42 = vld [vmem:[#allocation10 + $0x280] sm:$0xf]  ;;  %v2569_v46 = vld [vmem:[#allocation10 + $0x284] sm:$0xf0]  ;;  %v2488_v47 = vld [vmem:[#allocation10 + $0x4] sm:$0xf] }
  0xe5   : > { %v750_v11 = vadd.f32 %v749_v7, %v745_v56  ;;  %1446 = vmatpush.bf16.msra.mxu0 %v2159_v52  ;;  %v2334_v7 = vld [vmem:[#allocation10 + $0x270] sm:$0xf]  ;;  %v2056_v52 = vld [vmem:[#allocation10 + $0x48] sm:$0xf0] }
  0xe6   : > { %v692_v63 = vpop.f32.mrf.mxu2  ;;  %v716_v1 = vpop.f32.mrf.mxu0  ;;  %1433 = vmatpush.bf16.msrb.mxu3 %v2095_v51  ;;  %v2496_v51 = vld [vmem:[#allocation10 + $0x44] sm:$0xf] }
  0xe7   : > { %v705_v0 = vpop.f32.mrf.mxu3  ;;  %v3306_v3 = vadd.f32 %v716_v1, %v553_v54  ;;  %v729_v4 = vpop.f32.mrf.mxu1  ;;  %v2539_v54 = vld [vmem:[#allocation10 + $0x194] sm:$0xf0]  ;;  %v2150_v63 = vld [vmem:[#allocation10 + $0x100] sm:$0xf]  ;;  %v2087_v1 = vor.u32 %v2505_v62, %v2086_v59  ;;  %v2302_v59 = vld [vmem:[#allocation10 + $0x230] sm:$0xf] }
  0xe8   : > { %v3309_v6 = vadd.f32 %v729_v4, %v554_v61  ;;  %v2223_v55 = vor.u32 %v2539_v54, %v2222_v53  ;;  %v2023_v61 = vor.u32 %v2489_v58, %v2022_v57  ;;  %v2521_v0 = vld [vmem:[#allocation10 + $0x104] sm:$0xf0]  ;;  %v2214_v4 = vld [vmem:[#allocation10 + $0x180] sm:$0xf]  ;;  %v2375_v53 = vor.u32 %v2577_v50, %v2374_v48  ;;  %v2120_v57 = vld [vmem:[#allocation10 + $0xc8] sm:$0xf0] }
  0xe9   : > { %v738_v8 = vadd.f32 %v737_v5, %v3306_v3  ;;  %v746_v9 = vmul.f32 %v3306_v3, %v3306_v3  ;;  %v2151_v2 = vor.u32 %v2521_v0, %v2150_v63  ;;  %v2537_v5 = vld [vmem:[#allocation10 + $0x184] sm:$0xf0]  ;;  %v2059_v54 = vor.u32 %v2496_v51, %v2056_v52  ;;  %v2366_v62 = vld [vmem:[#allocation10 + $0x2b0] sm:$0xf]  ;;  %v2575_v0 = vld [vmem:[#allocation10 + $0x2b4] sm:$0xf0] }
  0xea   : > { %v747_v14 = vmul.f32 %v3309_v6, %v3309_v6  ;;  %1459 = vmatpush.bf16.msra.mxu1 %v2223_v55  ;;  %1421 = vmatpush.bf16.msrb.mxu2 %v2023_v61  ;;  %v2215_v56 = vor.u32 %v2537_v5, %v2214_v4  ;;  %v2512_v55 = vld [vmem:[#allocation10 + $0xc4] sm:$0xf]  ;;  %v2559_v61 = vld [vmem:[#allocation10 + $0x234] sm:$0xf0]  ;;  %v2367_v5 = vor.u32 %v2575_v0, %v2366_v62  ;;  %v2024_v48 = vld [vmem:[#allocation10 + $0x8] sm:$0xf0] }
  0xeb   : > { %v739_v10 = vadd.f32 %v738_v8, %v3309_v6  ;;  %v751_v15 = vadd.f32 %v750_v11, %v746_v9  ;;  %v2567_v8 = vld [vmem:[#allocation10 + $0x274] sm:$0xf0]  ;;  %v2398_v9 = vld [vmem:[#allocation10 + $0x2f0] sm:$0xf]  ;;  %1434 = vmatpush.bf16.msrb.mxu3 %v2087_v1  ;;  %1447 = vmatpush.bf16.msra.mxu0 %v2151_v2  ;;  %v2123_v58 = vor.u32 %v2512_v55, %v2120_v57  ;;  %v2494_v1 = vld [vmem:[#allocation10 + $0x34] sm:$0xf] }
  0xec   : > { %v2335_v11 = vor.u32 %v2567_v8, %v2334_v7  ;;  %v2303_v63 = vor.u32 %v2559_v61, %v2302_v59  ;;  %v2048_v2 = vld [vmem:[#allocation10 + $0x38] sm:$0xf0]  ;;  %v2027_v50 = vor.u32 %v2488_v47, %v2024_v48  ;;  %v2504_v51 = vld [vmem:[#allocation10 + $0x84] sm:$0xf]  ;;  %v2088_v52 = vld [vmem:[#allocation10 + $0x88] sm:$0xf0] }
  0xed   : > { %740 = vadd.xlane.f32.xlu0 %v739_v10  ;;  %v752_v16 = vadd.f32 %v751_v15, %v747_v14  ;;  %v2583_v10 = vld [vmem:[#allocation10 + $0x2f4] sm:$0xf0]  ;;  %v2080_v14 = vld [vmem:[#allocation10 + $0x78] sm:$0xf0]  ;;  %v2518_v15 = vld [vmem:[#allocation10 + $0xf4] sm:$0xf]  ;;  %v2051_v7 = vor.u32 %v2494_v1, %v2048_v2 }
  0xee   : > { %v718_v12 = vpop.f32.mrf.mxu0  ;;  %1460 = vmatpush.bf16.msra.mxu1 %v2215_v56  ;;  %1466 = vmatpush.bf16.msra.mxu2 %v2335_v11  ;;  %v2147_v20 = vor.u32 %v2518_v15, %v2144_v17  ;;  %v2510_v56 = vld [vmem:[#allocation10 + $0xb4] sm:$0xf]  ;;  %v2112_v8 = vld [vmem:[#allocation10 + $0xb8] sm:$0xf0]  ;;  %v2557_v11 = vld [vmem:[#allocation10 + $0x224] sm:$0xf0] }
  0xef   : > { %v731_v13 = vpop.f32.mrf.mxu1  ;;  %v2399_v12 = vor.u32 %v2583_v10, %v2398_v9  ;;  %v2294_v9 = vld [vmem:[#allocation10 + $0x220] sm:$0xf]  ;;  %v2115_v10 = vor.u32 %v2510_v56, %v2112_v8  ;;  %v2040_v15 = vld [vmem:[#allocation10 + $0x28] sm:$0xf0]  ;;  %v3323_v61 = vld [vmem:[#allocation7] sm:$0x3f] }
  0xf0   : > { %v2502_v13 = vld [vmem:[#allocation10 + $0x74] sm:$0xf]  ;;  %v784_v8 = vperm.slane %v3323_v61, 1 }
  0xf1   : > { %1479 = vmatpush.bf16.msra.mxu3 %v2399_v12  ;;  %v2358_v12 = vld [vmem:[#allocation10 + $0x2a0] sm:$0xf] }
  0xf2   : > { %1505 = vmatpush.bf16.msrb.mxu1 %v2147_v20  ;;  %1467 = vmatpush.bf16.msra.mxu2 %v2327_v21  ;;  %v2286_v20 = vld [vmem:[#allocation10 + $0x210] sm:$0xf] }
  0xf3   : > { %v2287_v33 = vor.u32 %v2555_v22, %v2286_v20  ;;  %v2208_v20 = vld [vmem:[#allocation10 + $0x178] sm:$0xf0] }
  0xf5   : > { %753 = vadd.xlane.f32.xlu0 %v752_v16  ;;  %v2083_v16 = vor.u32 %v2502_v13, %v2080_v14  ;;  %1480 = vmatpush.bf16.msra.mxu3 %v2391_v25  ;;  %v2573_v13 = vld [vmem:[#allocation10 + $0x2a4] sm:$0xf0]  ;;  %v2492_v14 = vld [vmem:[#allocation10 + $0x24] sm:$0xf] }
  0xf6   : > { %1506 = vmatpush.bf16.msrb.mxu1 %v2139_v31  ;;  %1468 = vmatpush.bf16.msra.mxu2 %v2319_v36  ;;  %v2359_v17 = vor.u32 %v2573_v13, %v2358_v12  ;;  %v2043_v21 = vor.u32 %v2492_v14, %v2040_v15  ;;  %v2096_v31 = vld [vmem:[#allocation10 + $0x98] sm:$0xf0]  ;;  %v2035_v36 = vor.u32 %v2490_v28, %v2032_v29  ;;  %v2550_v28 = vld [vmem:[#allocation10 + $0x1f4] sm:$0xf] }
  0xf7   : > { %1492 = vmatpush.bf16.msrb.mxu0 %v2083_v16  ;;  %v2295_v16 = vor.u32 %v2557_v11, %v2294_v9  ;;  %v786_v9 = vperm.slane %v3323_v61, 3  ;;  %v2272_v29 = vld [vmem:[#allocation10 + $0x1f8] sm:$0xf0] }
  0xf9   : > { %1481 = vmatpush.bf16.msra.mxu3 %v2383_v40  ;;  %v2278_v40 = vld [vmem:[#allocation10 + $0x200] sm:$0xf] }
  0xfa   : > { %1507 = vmatpush.bf16.msrb.mxu1 %v2131_v44  ;;  %1469 = vmatpush.bf16.msra.mxu2 %v2311_v49  ;;  %v2343_v49 = vor.u32 %v2569_v46, %v2342_v42  ;;  %v2275_v42 = vor.u32 %v2550_v28, %v2272_v29  ;;  %v788_v46 = vperm.slane %v3323_v61, 5  ;;  %v2526_v29 = vld [vmem:[#allocation10 + $0x134] sm:$0xf] }
  0xfb   : > { %1493 = vmatpush.bf16.msrb.mxu0 %v2075_v30  ;;  %v2506_v30 = vld [vmem:[#allocation10 + $0x94] sm:$0xf] }
  0xfc   : > { %v2099_v39 = vor.u32 %v2506_v30, %v2096_v31  ;;  %v2211_v30 = vor.u32 %v2534_v19, %v2208_v20  ;;  %v2566_v31 = vld [vmem:[#allocation10 + $0x274] sm:$0xf]  ;;  %v2560_v19 = vld [vmem:[#allocation10 + $0x244] sm:$0xf]  ;;  %v2312_v20 = vld [vmem:[#allocation10 + $0x248] sm:$0xf0] }
  0xfd   : > { %1482 = vmatpush.bf16.msra.mxu3 %v2375_v53 }
  0xfe   : > { %1508 = vmatpush.bf16.msrb.mxu1 %v2123_v58  ;;  %1470 = vmatpush.bf16.msra.mxu2 %v2303_v63  ;;  %v3325_v63 = vld [vmem:[#allocation9] sm:$0x3f] }
  0xff   : > { %1494 = vmatpush.bf16.msrb.mxu0 %v2067_v41  ;;  %v2553_v41 = vld [vmem:[#allocation10 + $0x204] sm:$0xf0]  ;;  %v802_v56 = vperm.slane %v3325_v63, 0  ;;  %v805_v11 = vperm.slane %v3325_v63, 3 }
 0x100   : > { %v2279_v44 = vor.u32 %v2553_v41, %v2278_v40  ;;  %v2400_v41 = vld [vmem:[#allocation10 + $0x2f8] sm:$0xf0] }
 0x101   : > { %1483 = vmatpush.bf16.msra.mxu3 %v2367_v5  ;;  %v783_v5 = vperm.slane %v3323_v61, 0 }
 0x102   : > { %1509 = vmatpush.bf16.msrb.mxu1 %v2115_v10  ;;  %1471 = vmatpush.bf16.msra.mxu2 %v2295_v16  ;;  %v803_v10 = vperm.slane %v3325_v63, 1 }
 0x103   : > { %1495 = vmatpush.bf16.msrb.mxu0 %v2059_v54  ;;  %v2091_v54 = vor.u32 %v2504_v51, %v2088_v52  ;;  %v2548_v52 = vld [vmem:[#allocation10 + $0x1e4] sm:$0xf] }
 0x105   : > { %1484 = vmatpush.bf16.msra.mxu3 %v2359_v17 }
 0x106   : > { %1510 = vmatpush.bf16.msrb.mxu1 %v2107_v26  ;;  %1472 = vmatpush.bf16.msra.mxu2 %v2287_v33  ;;  %v2336_v33 = vld [vmem:[#allocation10 + $0x278] sm:$0xf0] }
 0x107   : > { %1496 = vmatpush.bf16.msrb.mxu0 %v2051_v7 }
 0x109   : > { %1485 = vmatpush.bf16.msra.mxu3 %v2351_v34  ;;  %v2582_v34 = vld [vmem:[#allocation10 + $0x2f4] sm:$0xf] }
 0x10a   : > { %1511 = vmatpush.bf16.msrb.mxu1 %v2099_v39  ;;  %1473 = vmatpush.bf16.msra.mxu2 %v2279_v44  ;;  %v2403_v51 = vor.u32 %v2582_v34, %v2400_v41  ;;  %v2542_v34 = vld [vmem:[#allocation10 + $0x1b4] sm:$0xf] }
 0x10b   : > { %1497 = vmatpush.bf16.msrb.mxu0 %v2043_v21  ;;  %v787_v21 = vperm.slane %v3323_v61, 4 }
 0x10d   : > { %1486 = vmatpush.bf16.msra.mxu3 %v2343_v49 }
 0x10e   : > { %1512 = vmatpush.bf16.msrb.mxu1 %v2091_v54  ;;  %v2564_v54 = vld [vmem:[#allocation10 + $0x264] sm:$0xf] }
 0x10f   : > { %1498 = vmatpush.bf16.msrb.mxu0 %v2035_v36 }
 0x113   : > { %1499 = vmatpush.bf16.msrb.mxu0 %v2027_v50  ;;  %v2532_v50 = vld [vmem:[#allocation10 + $0x164] sm:$0xf] }
 0x160   : > { %v741_v4 = vpop.xlane.xlu0 %740 }
 0x161   : > { %v3319_v25 = vmul.f32 0.0013020834, %v741_v4 }
 0x163   : > { %v757_v37 = vmul.f32 %v3319_v25, %v3319_v25  ;;  %v759_v0 = vsub.f32 %v3286_v27, %v3319_v25  ;;  %v760_v1 = vsub.f32 %v3288_v32, %v3319_v25  ;;  %v761_v2 = vsub.f32 %v3290_v45, %v3319_v25 }
 0x164   : > { %v762_v7 = vsub.f32 %v3301_v60, %v3319_v25  ;;  %v785_v27 = vperm.slane %v3323_v61, 2  ;;  %v804_v45 = vperm.slane %v3325_v63, 2  ;;  %v764_v36 = vsub.f32 %v3309_v6, %v3319_v25  ;;  %v2200_v6 = vld [vmem:[#allocation10 + $0x168] sm:$0xf0] }
 0x165   : > { %v806_v61 = vperm.slane %v3325_v63, 4 }
 0x168   : > { %v754_v35 = vpop.xlane.xlu0 %753 }
 0x169   : > { %v756_v38 = vmul.f32 0.0013020834, %v754_v35  ;;  %v763_v35 = vsub.f32 %v3306_v3, %v3319_v25  ;;  %v2339_v25 = vor.u32 %v2566_v31, %v2336_v33  ;;  %v2315_v31 = vor.u32 %v2560_v19, %v2312_v20 }
 0x16b   : > { %v758_v43 = vsub.f32 %v756_v38, %v757_v37 }
 0x16d   : > { %v765_v53 = vadd.f32 1e-05, %v758_v43 }
 0x16f   : > { %2727 = vrsqrt.f32 %v765_v53  ;;  %vm772_vm2 = vweird.f32 %v765_v53 }
 0x175   : > { %v2728_v55 = vpop.eup %2727 }
 0x176   : > { %v767_v57 = vmul.f32 %v2728_v55, %v765_v53  ;;  %vm773_vm1 = vweird.f32 %v2728_v55  ;;  %v2264_v53 = vld [vmem:[#allocation10 + $0x1e8] sm:$0xf0] }
 0x177   : > { %vm774_vm3 = vmor %vm772_vm2, %vm773_vm1 }
 0x178   : > { %v768_v58 = vmul.f32 %v2728_v55, %v767_v57  ;;  %v2580_v57 = vld [vmem:[#allocation10 + $0x2e4] sm:$0xf] }
 0x17a   : > { %v769_v59 = vmul.f32 0.5, %v768_v58  ;;  %v2392_v58 = vld [vmem:[#allocation10 + $0x2e8] sm:$0xf0] }
 0x17c   : > { %v770_v62 = vsub.f32 1.5, %v769_v59  ;;  %v2203_v59 = vor.u32 %v2532_v50, %v2200_v6 }
 0x17e   : > { %v771_v4 = vmul.f32 %v2728_v55, %v770_v62  ;;  %v2267_v62 = vor.u32 %v2548_v52, %v2264_v53  ;;  %v2556_v52 = vld [vmem:[#allocation10 + $0x224] sm:$0xf]  ;;  %v2296_v53 = vld [vmem:[#allocation10 + $0x228] sm:$0xf0] }
 0x180   : > { %v775_v32 = vsel %vm774_vm3, %v2728_v55, %v771_v4  ;;  %v2328_v55 = vld [vmem:[#allocation10 + $0x268] sm:$0xf0] }
 0x181   : > { %v776_v12 = vmul.f32 %v775_v32, %v759_v0  ;;  %v777_v13 = vmul.f32 %v775_v32, %v760_v1  ;;  %v778_v14 = vmul.f32 %v775_v32, %v761_v2  ;;  %v779_v60 = vmul.f32 %v775_v32, %v762_v7  ;;  %v2530_v0 = vld [vmem:[#allocation10 + $0x154] sm:$0xf]  ;;  %v2192_v1 = vld [vmem:[#allocation10 + $0x158] sm:$0xf0] }
 0x182   : > { %v780_v43 = vmul.f32 %v775_v32, %v763_v35  ;;  %v781_v44 = vmul.f32 %v775_v32, %v764_v36  ;;  %v2331_v7 = vor.u32 %v2564_v54, %v2328_v55  ;;  %v2320_v32 = vld [vmem:[#allocation10 + $0x258] sm:$0xf0]  ;;  %v2558_v36 = vld [vmem:[#allocation10 + $0x234] sm:$0xf]  ;;  %v2572_v54 = vld [vmem:[#allocation10 + $0x2a4] sm:$0xf] }
 0x183   : > { %v795_v15 = vmul.f32 %v783_v5, %v776_v12  ;;  %v796_v16 = vmul.f32 %v784_v8, %v777_v13  ;;  %v797_v17 = vmul.f32 %v785_v27, %v778_v14  ;;  %v798_v18 = vmul.f32 %v786_v9, %v779_v60  ;;  %v2546_v8 = vld [vmem:[#allocation10 + $0x1d4] sm:$0xf]  ;;  %v2256_v27 = vld [vmem:[#allocation10 + $0x1d8] sm:$0xf0]  ;;  %v2528_v13 = vld [vmem:[#allocation10 + $0x144] sm:$0xf] }
 0x184   : > { %v799_v2 = vmul.f32 %v787_v21, %v780_v43  ;;  %v800_v4 = vmul.f32 %v788_v46, %v781_v44  ;;  %v807_v5 = vperm.slane %v3325_v63, 5  ;;  %v2562_v9 = vld [vmem:[#allocation10 + $0x254] sm:$0xf]  ;;  %v2259_v12 = vor.u32 %v2546_v8, %v2256_v27  ;;  %v2184_v14 = vld [vmem:[#allocation10 + $0x148] sm:$0xf0] }
 0x185   : > { %v814_v22 = vadd.f32 %v802_v56, %v795_v15  ;;  %v815_v23 = vadd.f32 %v803_v10, %v796_v16  ;;  %v816_v24 = vadd.f32 %v804_v45, %v797_v17  ;;  %v817_v26 = vadd.f32 %v805_v11, %v798_v18  ;;  %v2578_v10 = vld [vmem:[#allocation10 + $0x2d4] sm:$0xf]  ;;  %v2384_v45 = vld [vmem:[#allocation10 + $0x2d8] sm:$0xf0]  ;;  %v2544_v17 = vld [vmem:[#allocation10 + $0x1c4] sm:$0xf] }
 0x186   : > { %v2395_v56 = vor.u32 %v2580_v57, %v2392_v58  ;;  %v2195_v11 = vor.u32 %v2530_v0, %v2192_v1  ;;  %v818_v60 = vadd.f32 %v806_v61, %v799_v2  ;;  %v819_v15 = vadd.f32 %v807_v5, %v800_v4  ;;  %v2248_v18 = vld [vmem:[#allocation10 + $0x1c8] sm:$0xf0]  ;;  %v2576_v21 = vld [vmem:[#allocation10 + $0x2c4] sm:$0xf]  ;;  %v2240_v35 = vld [vmem:[#allocation10 + $0x1b8] sm:$0xf0] }
 0x187   : > { %v820_v37 = vmax.f32 %v814_v22, 0.0  ;;  %v821_v38 = vmax.f32 %v815_v23, 0.0  ;;  %v822_v39 = vmax.f32 %v816_v24, 0.0  ;;  %v823_v40 = vmax.f32 %v817_v26, 0.0  ;;  %v2376_v22 = vld [vmem:[#allocation10 + $0x2c8] sm:$0xf0] }
 0x188   : > { %v2323_v63 = vor.u32 %v2562_v9, %v2320_v32  ;;  %v2387_v16 = vor.u32 %v2578_v10, %v2384_v45  ;;  %v2187_v23 = vor.u32 %v2528_v13, %v2184_v14  ;;  %v2251_v24 = vor.u32 %v2544_v17, %v2248_v18  ;;  %v2524_v44 = vld [vmem:[#allocation10 + $0x124] sm:$0xf]  ;;  %v2168_v46 = vld [vmem:[#allocation10 + $0x128] sm:$0xf0]  ;;  %v2160_v61 = vld [vmem:[#allocation10 + $0x118] sm:$0xf0] }
 0x189   : > { %v3349_v47 = vpack.c.bf16 %v820_v37, %v820_v37  ;;  %v3351_v48 = vpack.c.bf16 %v821_v38, %v821_v38  ;;  %v3353_v49 = vpack.c.bf16 %v822_v39, %v822_v39  ;;  %v3355_v3 = vpack.c.bf16 %v823_v40, %v823_v40  ;;  %v2304_v37 = vld [vmem:[#allocation10 + $0x238] sm:$0xf0]  ;;  %v2574_v38 = vld [vmem:[#allocation10 + $0x2b4] sm:$0xf]  ;;  %v2360_v55 = vld [vmem:[#allocation10 + $0x2a8] sm:$0xf0] }
 0x18a   : > { %v824_v26 = vmax.f32 %v818_v60, 0.0  ;;  %v825_v28 = vmax.f32 %v819_v15, 0.0  ;;  %v2379_v33 = vor.u32 %v2576_v21, %v2376_v22  ;;  %v2368_v39 = vld [vmem:[#allocation10 + $0x2b8] sm:$0xf0]  ;;  %v2243_v43 = vor.u32 %v2542_v34, %v2240_v35  ;;  %v2538_v1 = vld [vmem:[#allocation10 + $0x194] sm:$0xf] }
 0x18b   : > { %1422 = vmatmul.bf16.vlgmr.msrb.gmra.mxu2 %v3349_v47  ;;  %1435 = vmatmul.bf16.vlgmr.msrb.gmra.mxu3 %v3351_v48  ;;  %v2307_v50 = vor.u32 %v2558_v36, %v2304_v37  ;;  %v2371_v6 = vor.u32 %v2574_v38, %v2368_v39  ;;  %v2171_v57 = vor.u32 %v2524_v44, %v2168_v46  ;;  %v2224_v2 = vld [vmem:[#allocation10 + $0x198] sm:$0xf0]  ;;  %v2554_v4 = vld [vmem:[#allocation10 + $0x214] sm:$0xf]  ;;  %v2520_v8 = vld [vmem:[#allocation10 + $0x104] sm:$0xf] }
 0x18c   : > { %1448 = vmatmul.bf16.vlgmr.msra.gmra.mxu0 %v3353_v49  ;;  %1461 = vmatmul.bf16.vlgmr.msra.gmra.mxu1 %v3355_v3  ;;  %v3363_v41 = vpack.c.bf16 %v824_v26, %v824_v26  ;;  %v2363_v0 = vor.u32 %v2572_v54, %v2360_v55  ;;  %v2288_v5 = vld [vmem:[#allocation10 + $0x218] sm:$0xf0]  ;;  %v2152_v27 = vld [vmem:[#allocation10 + $0x108] sm:$0xf0]  ;;  %v2536_v10 = vld [vmem:[#allocation10 + $0x184] sm:$0xf] }
 0x18d   : > { %1518 = vmatpush.bf16.msrb.mxu2 %v2211_v30  ;;  %1531 = vmatpush.bf16.msrb.mxu3 %v2275_v42  ;;  %v2176_v30 = vld [vmem:[#allocation10 + $0x138] sm:$0xf0]  ;;  %v3365_v42 = vpack.c.bf16 %v825_v28, %v825_v28  ;;  %v2291_v9 = vor.u32 %v2554_v4, %v2288_v5  ;;  %v2216_v45 = vld [vmem:[#allocation10 + $0x188] sm:$0xf0]  ;;  %v2568_v13 = vld [vmem:[#allocation10 + $0x284] sm:$0xf]  ;;  %v2155_v60 = vor.u32 %v2520_v8, %v2152_v27 }
 0x18e   : > { %1544 = vmatpush.bf16.msra.mxu0 %v2339_v25  ;;  %1557 = vmatpush.bf16.msra.mxu1 %v2403_v51  ;;  %v2179_v40 = vor.u32 %v2526_v29, %v2176_v30  ;;  %v2540_v25 = vld [vmem:[#allocation10 + $0x1a4] sm:$0xf]  ;;  %v2232_v51 = vld [vmem:[#allocation10 + $0x1a8] sm:$0xf0]  ;;  %v2219_v15 = vor.u32 %v2536_v10, %v2216_v45  ;;  %v928_v29 = vld [vmem:[#allocation12] sm:$0x3] }
 0x18f   : > { %v2235_v58 = vor.u32 %v2540_v25, %v2232_v51  ;;  %v2344_v14 = vld [vmem:[#allocation10 + $0x288] sm:$0xf0]  ;;  %v931_v35 = vperm.slane %v928_v29, 1  ;;  %v2599_v4 = vld [vmem:[#allocation13 + $0x78] sm:$0xff]  ;;  %v2590_v5 = vld [vmem:[#allocation13 + $0x30] sm:$0xff] }
 0x190   : > { %v2596_v8 = vld [vmem:[#allocation13 + $0x60] sm:$0xff]  ;;  %v2587_v27 = vld [vmem:[#allocation13 + $0x18] sm:$0xff]  ;;  %v2586_v10 = vld [vmem:[#allocation13 + $0x10] sm:$0xff] }
 0x191   : > { %1519 = vmatpush.bf16.msrb.mxu2 %v2203_v59  ;;  %1532 = vmatpush.bf16.msrb.mxu3 %v2267_v62  ;;  %v2522_v59 = vld [vmem:[#allocation10 + $0x114] sm:$0xf]  ;;  %v2299_v62 = vor.u32 %v2556_v52, %v2296_v53 }
 0x192   : > { %1545 = vmatpush.bf16.msra.mxu0 %v2331_v7  ;;  %1558 = vmatpush.bf16.msra.mxu1 %v2395_v56  ;;  %v2570_v7 = vld [vmem:[#allocation10 + $0x294] sm:$0xf]  ;;  %v2352_v56 = vld [vmem:[#allocation10 + $0x298] sm:$0xf0] }
 0x193   : > { %v2355_v32 = vor.u32 %v2570_v7, %v2352_v56  ;;  %v2598_v7 = vld [vmem:[#allocation13 + $0x70] sm:$0xff]  ;;  %v2589_v56 = vld [vmem:[#allocation13 + $0x28] sm:$0xff] }
 0x194   : > { %v2594_v45 = vld [vmem:[#allocation13 + $0x50] sm:$0xff] }
 0x195   : > { %1520 = vmatpush.bf16.msrb.mxu2 %v2195_v11  ;;  %1533 = vmatpush.bf16.msrb.mxu3 %v2259_v12  ;;  %v2552_v11 = vld [vmem:[#allocation10 + $0x204] sm:$0xf]  ;;  %v2280_v12 = vld [vmem:[#allocation10 + $0x208] sm:$0xf0] }
 0x196   : > { %1546 = vmatpush.bf16.msra.mxu0 %v2323_v63  ;;  %1559 = vmatpush.bf16.msra.mxu1 %v2387_v16  ;;  %v2283_v63 = vor.u32 %v2552_v11, %v2280_v12  ;;  %v2347_v16 = vor.u32 %v2568_v13, %v2344_v14  ;;  %v2585_v11 = vld [vmem:[#allocation13 + $0x8] sm:$0xff]  ;;  %v2584_v14 = vld [vmem:[#allocation13] sm:$0xff] }
 0x197   : > { %v2593_v12 = vld [vmem:[#allocation13 + $0x48] sm:$0xff] }
 0x199   : > { %1521 = vmatpush.bf16.msrb.mxu2 %v2187_v23  ;;  %1534 = vmatpush.bf16.msrb.mxu3 %v2251_v24 }
 0x19a   : > { %1547 = vmatpush.bf16.msra.mxu0 %v2315_v31  ;;  %1560 = vmatpush.bf16.msra.mxu1 %v2379_v33 }
 0x19b   : > { %1474 = vmatmul.bf16.vlgmr.msra.gmra.mxu2 %v3363_v41  ;;  %1487 = vmatmul.bf16.vlgmr.msra.gmra.mxu3 %v3365_v42 }
 0x19c   : > { %1500 = vmatmul.bf16.vlgmr.msrb.gmra.mxu0 %v3349_v47  ;;  %1513 = vmatmul.bf16.vlgmr.msrb.gmra.mxu1 %v3351_v48  ;;  %v2163_v47 = vor.u32 %v2522_v59, %v2160_v61  ;;  %v2227_v48 = vor.u32 %v2538_v1, %v2224_v2  ;;  %v2591_v2 = vld [vmem:[#allocation13 + $0x38] sm:$0xff] }
 0x19d   : > { %1522 = vmatpush.bf16.msrb.mxu2 %v2179_v40  ;;  %1535 = vmatpush.bf16.msrb.mxu3 %v2243_v43 }
 0x19e   : > { %1548 = vmatpush.bf16.msra.mxu0 %v2307_v50  ;;  %1561 = vmatpush.bf16.msra.mxu1 %v2371_v6 }
 0x1a1   : > { %1523 = vmatpush.bf16.msrb.mxu2 %v2171_v57  ;;  %1536 = vmatpush.bf16.msrb.mxu3 %v2235_v58 }
 0x1a2   : > { %1549 = vmatpush.bf16.msra.mxu0 %v2299_v62  ;;  %1562 = vmatpush.bf16.msra.mxu1 %v2363_v0 }
 0x1a5   : > { %1524 = vmatpush.bf16.msrb.mxu2 %v2163_v47  ;;  %1537 = vmatpush.bf16.msrb.mxu3 %v2227_v48  ;;  %v2597_v47 = vld [vmem:[#allocation13 + $0x68] sm:$0xff]  ;;  %v2588_v48 = vld [vmem:[#allocation13 + $0x20] sm:$0xff] }
 0x1a6   : > { %1550 = vmatpush.bf16.msra.mxu0 %v2291_v9  ;;  %1563 = vmatpush.bf16.msra.mxu1 %v2355_v32  ;;  %v2595_v9 = vld [vmem:[#allocation13 + $0x58] sm:$0xff] }
 0x1a9   : > { %1525 = vmatpush.bf16.msrb.mxu2 %v2155_v60  ;;  %1538 = vmatpush.bf16.msrb.mxu3 %v2219_v15  ;;  %v2592_v60 = vld [vmem:[#allocation13 + $0x40] sm:$0xff] }
 0x1aa   : > { %1551 = vmatpush.bf16.msra.mxu0 %v2283_v63  ;;  %1564 = vmatpush.bf16.msra.mxu1 %v2347_v16 }
 0x1ac   : > { %1526 = vmatmul.bf16.vlgmr.msrb.gmra.mxu2 %v3353_v49  ;;  %1539 = vmatmul.bf16.vlgmr.msrb.gmra.mxu3 %v3355_v3  ;;  %v930_v49 = vperm.slane %v928_v29, 0 }
 0x1ad   : > { %1552 = vmatmul.bf16.vlgmr.msra.gmra.mxu0 %v3363_v41  ;;  %1565 = vmatmul.bf16.vlgmr.msra.gmra.mxu1 %v3365_v42 }
 0x1ae   : > { %1749 = vmatpush.bf16.msra.mxu2 %v2591_v2  ;;  %1762 = vmatpush.bf16.msra.mxu3 %v2599_v4 }
 0x1b2   : > { %1750 = vmatpush.bf16.msra.mxu2 %v2590_v5  ;;  %1763 = vmatpush.bf16.msra.mxu3 %v2598_v7 }
 0x1b6   : > { %1751 = vmatpush.bf16.msra.mxu2 %v2589_v56  ;;  %1764 = vmatpush.bf16.msra.mxu3 %v2597_v47 }
 0x1ba   : > { %1752 = vmatpush.bf16.msra.mxu2 %v2588_v48  ;;  %1765 = vmatpush.bf16.msra.mxu3 %v2596_v8 }
 0x1be   : > { %1753 = vmatpush.bf16.msra.mxu2 %v2587_v27  ;;  %1766 = vmatpush.bf16.msra.mxu3 %v2595_v9 }
 0x1c2   : > { %1754 = vmatpush.bf16.msra.mxu2 %v2586_v10  ;;  %1767 = vmatpush.bf16.msra.mxu3 %v2594_v45 }
 0x1c6   : > { %1755 = vmatpush.bf16.msra.mxu2 %v2585_v11  ;;  %1768 = vmatpush.bf16.msra.mxu3 %v2593_v12 }
 0x1ca   : > { %1756 = vmatpush.bf16.msra.mxu2 %v2584_v14  ;;  %1769 = vmatpush.bf16.msra.mxu3 %v2592_v60 }
 0x209   : > { %v1449_v17 = vpop.f32.mrf.mxu0  ;;  %v1462_v18 = vpop.f32.mrf.mxu1 }
 0x20e   : > { %v1423_v19 = vpop.f32.mrf.mxu2  ;;  %v1436_v20 = vpop.f32.mrf.mxu3 }
 0x20f   : > { %v1424_v34 = vadd.f32 %v1423_v19, %v930_v49 }
 0x211   : > { %v1451_v21 = vpop.f32.mrf.mxu0  ;;  %v1464_v22 = vpop.f32.mrf.mxu1  ;;  %v1437_v38 = vadd.f32 %v1436_v20, %v1424_v34 }
 0x213   : > { %v1450_v42 = vadd.f32 %v1449_v17, %v1437_v38 }
 0x215   : > { %v1463_v50 = vadd.f32 %v1462_v18, %v1450_v42 }
 0x216   : > { %v1425_v23 = vpop.f32.mrf.mxu2  ;;  %v1438_v24 = vpop.f32.mrf.mxu3 }
 0x217   : > { %v1570_v24 = vld [vmem:[%s3418_s7] sm:$0x3] }
 0x218   : > { %v1601_v49 = vperm.slane %v1570_v24, 1 }
 0x219   : > { %v1501_v26 = vpop.f32.mrf.mxu0  ;;  %v1514_v28 = vpop.f32.mrf.mxu1 }
 0x21a   : > { %v1502_v39 = vadd.f32 %v1501_v26, %v931_v35 }
 0x21c   : > { %v1515_v43 = vadd.f32 %v1514_v28, %v1502_v39  ;;  %v1571_v28 = vld [vmem:[%s3419_s8] sm:$0x3] }
 0x21d   : > { %v1607_v35 = vperm.slane %v1571_v28, 0 }
 0x21e   : > { %v1475_v30 = vpop.f32.mrf.mxu2  ;;  %v1488_v31 = vpop.f32.mrf.mxu3 }
 0x21f   : > { %v1476_v25 = vadd.f32 %v1475_v30, %v1463_v50 }
 0x221   : > { %v1503_v33 = vpop.f32.mrf.mxu0  ;;  %v1516_v3 = vpop.f32.mrf.mxu1  ;;  %v3375_v55 = vadd.f32 %v1488_v31, %v1476_v25  ;;  %v1600_v31 = vperm.slane %v1570_v24, 0 }
 0x223   : > { %v1575_v0 = vmul.f32 %v3375_v55, %v3375_v55 }
 0x226   : > { %v1477_v36 = vpop.f32.mrf.mxu2  ;;  %v1490_v37 = vpop.f32.mrf.mxu3 }
 0x227   : > { %v1608_v36 = vperm.slane %v1571_v28, 1 }
 0x22a   : > { %v1553_v40 = vpop.f32.mrf.mxu0  ;;  %v1566_v41 = vpop.f32.mrf.mxu1 }
 0x22f   : > { %v1527_v44 = vpop.f32.mrf.mxu2  ;;  %v1540_v46 = vpop.f32.mrf.mxu3 }
 0x230   : > { %v1528_v6 = vadd.f32 %v1527_v44, %v1515_v43 }
 0x232   : > { %v1541_v51 = vadd.f32 %v1540_v46, %v1528_v6  ;;  %v1555_v52 = vpop.f32.mrf.mxu0  ;;  %v1568_v53 = vpop.f32.mrf.mxu1  ;;  %v2726_v46 = vld [vmem:[#allocation15] ss:$0 sm:$0xff] }
 0x234   : > { %v1554_v54 = vadd.f32 %v1553_v40, %v1541_v51 }
 0x236   : > { %v3377_v57 = vadd.f32 %v1566_v41, %v1554_v54 }
 0x237   : > { %v1529_v58 = vpop.f32.mrf.mxu2  ;;  %v1542_v59 = vpop.f32.mrf.mxu3 }
 0x238   : > { %v1572_v61 = vadd.f32 %v3377_v57, %v3375_v55  ;;  %v1576_v62 = vmul.f32 %v3377_v57, %v3377_v57 }
 0x23a   : > { %1573 = vadd.xlane.f32.xlu1 %v1572_v61  ;;  %v1577_v1 = vadd.f32 %v1576_v62, %v1575_v0 }
 0x242   : > { %1578 = vadd.xlane.f32.xlu1 %v1577_v1 }
 0x2ad   : > { %v1574_v32 = vpop.xlane.xlu1 %1573 }
 0x2ae   : > { %v1580_v13 = vmul.f32 0.0052083335, %v1574_v32 }
 0x2b0   : > { %v1582_v63 = vmul.f32 %v1580_v13, %v1580_v13  ;;  %v1584_v29 = vsub.f32 %v3375_v55, %v1580_v13  ;;  %v1585_v30 = vsub.f32 %v3377_v57, %v1580_v13 }
 0x2b5   : > { %v1579_v15 = vpop.xlane.xlu1 %1578 }
 0x2b6   : > { %v1581_v16 = vmul.f32 0.0052083335, %v1579_v15 }
 0x2b8   : > { %v1583_v17 = vsub.f32 %v1581_v16, %v1582_v63 }
 0x2ba   : > { %v1586_v18 = vadd.f32 1e-05, %v1583_v17 }
 0x2bc   : > { %2729 = vrsqrt.f32 %v1586_v18  ;;  %vm1593_vm5 = vweird.f32 %v1586_v18 }
 0x2c2   : > { %v2730_v19 = vpop.eup %2729 }
 0x2c3   : > { %v1588_v20 = vmul.f32 %v2730_v19, %v1586_v18  ;;  %vm1594_vm4 = vweird.f32 %v2730_v19 }
 0x2c4   : > { %vm1595_vm6 = vmor %vm1593_vm5, %vm1594_vm4 }
 0x2c5   : > { %v1589_v21 = vmul.f32 %v2730_v19, %v1588_v20 }
 0x2c7   : > { %v1590_v22 = vmul.f32 0.5, %v1589_v21 }
 0x2c9   : > { %v1591_v23 = vsub.f32 1.5, %v1590_v22 }
 0x2cb   : > { %v1592_v26 = vmul.f32 %v2730_v19, %v1591_v23 }
 0x2cd   : > { %v1596_v33 = vsel %vm1595_vm6, %v2730_v19, %v1592_v26 }
 0x2ce   : > { %v1597_v3 = vmul.f32 %v1596_v33, %v1584_v29  ;;  %v1598_v34 = vmul.f32 %v1596_v33, %v1585_v30 }
 0x2d0   : > { %v1604_v37 = vmul.f32 %v1600_v31, %v1597_v3  ;;  %v1605_v38 = vmul.f32 %v1601_v49, %v1598_v34 }
 0x2d2   : > { %v1611_v39 = vadd.f32 %v1607_v35, %v1604_v37  ;;  %v1612_v40 = vadd.f32 %v1608_v36, %v1605_v38 }
 0x2d4   : > { %v1613_v41 = vmax.f32 %v1611_v39, 0.0  ;;  %v1614_v42 = vmax.f32 %v1612_v40, 0.0 }
 0x2d6   : > { %v1615_v43 = vpack.c.bf16 %v1613_v41, %v1613_v41  ;;  %v1616_v44 = vpack.c.bf16 %v1614_v42, %v1614_v42 }
 0x2d8   : > { %1757 = vmatmul.bf16.vlgmr.msra.gmra.mxu2 %v1615_v43  ;;  %1770 = vmatmul.bf16.vlgmr.msra.gmra.mxu3 %v1616_v44 }
 0x35b   : > { %v1758_v50 = vpop.f32.mrf.mxu2  ;;  %v1771_v6 = vpop.f32.mrf.mxu3 }
 0x35c   : > { %v1759_v25 = vadd.f32 %v2726_v46, %v1758_v50 }
 0x35e   : > { %v1772_v51 = vadd.f32 %v1771_v6, %v1759_v25 }
 0x360   : > { %2731 = vtanh.f32 %v1772_v51 }
 0x363   : > { %v1760_v52 = vpop.f32.mrf.mxu2  ;;  %v1773_v53 = vpop.f32.mrf.mxu3 }
 0x366   : > { %v2732_v54 = vpop.eup %2731 }
 0x367   : > { %1776 = vst [vmem:[%s525_s20] sm:$0xff] %v2732_v54 }
 0x368 PF: > { %p25_p3 = scmp.ge.s32.totalorder %s3208_s28, 5   ;;  %s3433_s17 = smov %s3045_s18 }
 0x369   : > { %s3434_s18 = smov %s3049_s19  ;;  %s3435_s19 = smov %s3219_s29 }
 0x36a   : > { %s3436_s20 = smov %s3208_s28  ;;  %27 = sbr.rel (!%p25_p3) target bundleno = 11 (0xb), region = 136 }
 0x36f   :  { %1796 = vsyncpa [#allocation3], 1 }
 0x370   :  { %1798 = vsyncpa [#allocation3 + $0x1], 1 }
 0x371   :  { %1799 = vsyncpa [#allocation5], 1 }
 0x372   :  { %1800 = vsyncpa [#allocation8], 1 }
 0x373   :  { %1801 = vsyncpa [#allocation11], 1 }
 0x374   :  { %1802 = vsyncpa [#allocation14], 1 }

</bundles_post_ra>
